<compile_context>
chip_gen: v5e
topology: v5e:2x2
jax: 0.10.0
libtpu: 0.0.40
codegen_flags: <defaults>
</compile_context>

<pallas_src>
import functools
import math

import jax
import jax.numpy as jnp
from jax import lax
from jax.experimental import pallas as pl
from jax.experimental.pallas import tpu as pltpu


def _layernorm(x, g, b, eps=1e-5):
    mu = jnp.mean(x, axis=-1, keepdims=True)
    xc = x - mu
    var = jnp.mean(xc * xc, axis=-1, keepdims=True)
    return xc * lax.rsqrt(var + eps) * g + b


def _clamped_log(t, eps=1e-20):
    # torch: log(t.clamp(min=eps))
    return jnp.log(jnp.maximum(t, eps))


# ---------------------------------------------------------------------------
# Parameter slab packing (lane-aligned segments -> clean 128-aligned loads).
# ---------------------------------------------------------------------------
_LANE = 128


def _pack_slab_1d(segments, align=_LANE):
    """segments: [(name, 1-D array)] -> ((1, K) f32 slab, {name: (offset, size)})."""
    parts, off, o = [], {}, 0
    for name, v in segments:
        v = jnp.asarray(v, jnp.float32).reshape(-1)
        sz = v.shape[0]
        pad = (-sz) % align
        off[name] = (o, sz)
        parts.append(v)
        if pad:
            parts.append(jnp.zeros((pad,), jnp.float32))
        o += sz + pad
    return jnp.concatenate(parts).reshape(1, -1), off


def _pack_slab_2d(segments, dtype, align=_LANE):
    """segments: [(name, (R, C) array)] -> ((R, K) slab, {name: (offset, cols)})."""
    parts, off, o = [], {}, 0
    rows = segments[0][1].shape[0]
    for name, w in segments:
        w = jnp.asarray(w, dtype)
        cols = w.shape[1]
        pad = (-cols) % align
        off[name] = (o, cols)
        parts.append(w)
        if pad:
            parts.append(jnp.zeros((rows, pad), dtype))
        o += cols + pad
    return jnp.concatenate(parts, axis=1), off


# ---------------------------------------------------------------------------
# Kernel
# ---------------------------------------------------------------------------
def adaptive_slot_kernel(
    # data (per-batch-block)
    x_ref, noise_ref, gu_ref,
    # packed parameters (full blocks, broadcast over the grid)
    vecs_ref, w_a_ref, w2_ref,
    # outputs
    slots_out_ref, keep_out_ref,
    *, iters, attn_eps, inv_temperature, vec_off, w_off,
):
    Bt, N, D = x_ref.shape
    S = noise_ref.shape[1]
    H = w2_ref.shape[0]
    R = Bt * S                       # batch-stacked slot rows
    cdt = w_a_ref.dtype              # MXU operand dtype (f32 or bf16)

    def vec(name):
        o, sz = vec_off[name]
        return vecs_ref[:, o:o + sz]          # (1, sz) f32, 128-aligned start

    def wgt(name):
        o, sz = w_off[name]
        return w_a_ref[:, o:o + sz]           # (D, sz) cdt, 128-aligned start

    # ---- hoisted parameter loads / bias broadcasts (reused across the
    #      statically-unrolled iteration loop) ----
    mu = vec('mu')
    sig = jnp.exp(vec('logsig'))
    g_in, b_in = vec('g_in'), vec('b_in')
    g_sl = jnp.broadcast_to(vec('g_sl'), (R, D))
    b_sl = jnp.broadcast_to(vec('b_sl'), (R, D))
    g_pre = jnp.broadcast_to(vec('g_pre'), (R, D))
    b_pre = jnp.broadcast_to(vec('b_pre'), (R, D))
    bq = jnp.broadcast_to(vec('bq'), (R, D))          # attn scale folded in
    bkv = vec('bkv')                                   # (1, 2D)
    b_gi = jnp.broadcast_to(vec('b_gi'), (R, 3 * D))
    b_gh = jnp.broadcast_to(vec('b_gh'), (R, 3 * D))
    b1 = jnp.broadcast_to(vec('b1'), (R, H))
    b2 = jnp.broadcast_to(vec('b2'), (R, D))

    wq = wgt('wq')            # (D, D)   attn scale folded in
    wkv = wgt('wkv')          # (D, 2D)  fused k|v projection
    w_gi = wgt('w_gi')        # (D, 3D)  GRU input-hidden  [r|z|n]
    w_gh = wgt('w_gh')        # (D, 3D)  GRU hidden-hidden [r|z|n]
    w1 = wgt('w1')            # (D, H)
    wkeep = wgt('wkeep')      # (D, 2)
    w2 = w2_ref[...]          # (H, D)

    # ---- batch-stacked data ----
    x_st = x_ref[...].reshape(Bt * N, D)
    noise_st = noise_ref[...].reshape(R, D)

    # slot init: slots = mu + exp(logsigma) * randn
    slots = mu + sig * noise_st                        # (R, D) f32

    # normalize inputs, fused k|v projection (one MXU op over Bt*N rows)
    xn = _layernorm(x_st, g_in, b_in)
    kv = jnp.dot(xn.astype(cdt), wkv, preferred_element_type=jnp.float32) + bkv
    k3 = kv[:, :D].reshape(Bt, N, D).astype(cdt)
    v3 = kv[:, D:].reshape(Bt, N, D).astype(cdt)

    # ---- iterative slot attention (iters is small -> static unroll) ----
    for _ in range(iters):
        slots_prev = slots

        sn = _layernorm(slots, g_sl, b_sl)
        q = jnp.dot(sn.astype(cdt), wq, preferred_element_type=jnp.float32) + bq
        q3 = q.reshape(Bt, S, D).astype(cdt)

        # dots[b, i, j] = <q_i, k_j>  (scale already folded into wq/bq)
        dots = jnp.einsum('bsd,bnd->bsn', q3, k3,
                          preferred_element_type=jnp.float32)     # (Bt, S, N)

        # softmax over the SLOT axis (torch dim=1), then renormalize over
        # tokens; exact divides (approx reciprocal compounded error).
        m = jnp.max(dots, axis=1, keepdims=True)
        e = jnp.exp(dots - m)
        attn = e / jnp.sum(e, axis=1, keepdims=True) + attn_eps
        attn = attn / jnp.sum(attn, axis=-1, keepdims=True)

        updates = jnp.einsum('bsn,bnd->bsd', attn.astype(cdt), v3,
                             preferred_element_type=jnp.float32).reshape(R, D)

        # ---- GRUCell as two accumulating (R, D) @ (D, 3D) matmuls ----
        gi = jnp.dot(updates.astype(cdt), w_gi,
                     preferred_element_type=jnp.float32) + b_gi
        gh = jnp.dot(slots_prev.astype(cdt), w_gh,
                     preferred_element_type=jnp.float32) + b_gh
        r = jax.nn.sigmoid(gi[:, :D] + gh[:, :D])
        z = jax.nn.sigmoid(gi[:, D:2 * D] + gh[:, D:2 * D])
        n = jnp.tanh(gi[:, 2 * D:] + r * gh[:, 2 * D:])
        slots = (1.0 - z) * n + z * slots_prev

        # ---- residual MLP on pre-norm slots ----
        pre = _layernorm(slots, g_pre, b_pre)
        h1 = jax.nn.relu(jnp.dot(pre.astype(cdt), w1,
                                 preferred_element_type=jnp.float32) + b1)
        slots = slots + jnp.dot(h1.astype(cdt), w2,
                                preferred_element_type=jnp.float32) + b2

    # ---- slot store (leading-dim split only; no lane relayout) ----
    slots_out_ref[...] = slots.reshape(Bt, S, D).astype(slots_out_ref.dtype)

    # ---- keep-slot prediction + gumbel softmax (hard, straight-through) ----
    logits = jnp.dot(slots.astype(cdt), wkeep,
                     preferred_element_type=jnp.float32)           # (R, 2)
    scaled = logits * inv_temperature
    gu = gu_ref[...].reshape(R, 2)
    gnoise = -_clamped_log(-_clamped_log(gu))
    noised = scaled + gnoise                                       # noise after 1/tau (as in spec)

    # argmax over size-2 last dim; keep_slots = hard_one_hot[..., -1]
    hard1 = (noised[:, 1:2] > noised[:, 0:1]).astype(jnp.float32)  # (R, 1)

    # soft path on scaled logits only (matches the module's gumbel_softmax);
    # forward-neutral straight-through term kept for fidelity.
    s0, s1 = scaled[:, 0:1], scaled[:, 1:2]
    mm = jnp.maximum(s0, s1)
    e0, e1 = jnp.exp(s0 - mm), jnp.exp(s1 - mm)
    soft1 = e1 / (e0 + e1)
    keep = hard1 + soft1 - lax.stop_gradient(soft1)
    # TODO(synk): straight-through gradient requires a custom_vjp around the
    # kernel; only the forward value (== hard one-hot) is produced here.

    keep_out_ref[...] = keep.reshape(Bt, S, 1).astype(keep_out_ref.dtype)


# ---------------------------------------------------------------------------
# Wrapper
# ---------------------------------------------------------------------------
def adaptive_slot_forward(x, slot_noise, gumbel_u, packed, *,
                          iters=3, eps=1e-8, temperature=1.0, batch_block=1):
    """Runs AdaptiveSlotWrapper.forward. Returns (slots (B,S,D), keep_slots (B,S)).

    batch_block: batches per grid step.  Keep B/batch_block >= 2 on v7x so both
    TensorCores get work ("parallel" grid axis); set batch_block=B on v5e/v6e
    to collapse to a single grid step and batch-stack all MXU rows.
    """
    B, N, D = x.shape
    S = slot_noise.shape[1]
    assert B % batch_block == 0, "batch_block must divide B"
    nb = B // batch_block
    Bt = batch_block

    vecs, w_a, w2 = packed['vecs'], packed['w_a'], packed['w2']

    in_specs = [
        pl.BlockSpec((Bt, N, D), lambda i: (i, 0, 0)),
        pl.BlockSpec((Bt, S, D), lambda i: (i, 0, 0)),
        pl.BlockSpec((Bt, S, 2), lambda i: (i, 0, 0)),
        # packed parameter slabs: full blocks, constant index (fetched once)
        pl.BlockSpec(vecs.shape, lambda i: (0, 0)),
        pl.BlockSpec(w_a.shape, lambda i: (0, 0)),
        pl.BlockSpec(w2.shape, lambda i: (0, 0)),
    ]
    out_shape = (jax.ShapeDtypeStruct((B, S, D), jnp.float32),
                 jax.ShapeDtypeStruct((B, S, 1), jnp.float32))
    out_specs = (pl.BlockSpec((Bt, S, D), lambda i: (i, 0, 0)),
                 pl.BlockSpec((Bt, S, 1), lambda i: (i, 0, 0)))

    kernel = functools.partial(
        adaptive_slot_kernel,
        iters=iters, attn_eps=eps, inv_temperature=1.0 / temperature,
        vec_off=packed['vec_off'], w_off=packed['w_off'])

    slots, keep = pl.pallas_call(
        kernel,
        out_shape=out_shape,
        grid_spec=pltpu.PrefetchScalarGridSpec(
            num_scalar_prefetch=0,
            grid=(nb,),
            in_specs=in_specs,
            out_specs=list(out_specs)),
        compiler_params=pltpu.CompilerParams(
            dimension_semantics=("parallel",)),
    )(x, slot_noise, gumbel_u, vecs, w_a, w2)

    return slots, keep[..., 0]


def init_params(key, dim, hidden_dim):
    """Deterministic synthetic parameters in torch conventions (W is (out, in))."""
    D, H = dim, hidden_dim
    ks = jax.random.split(key, 12)

    def lin(k, out_f, in_f, bias=True):
        s = 1.0 / math.sqrt(in_f)
        kw, kb = jax.random.split(k)
        w = jax.random.uniform(kw, (out_f, in_f), jnp.float32, -s, s)
        b = jax.random.uniform(kb, (out_f,), jnp.float32, -s, s) if bias else None
        return w, b

    p = {}
    p['mu'] = jax.random.normal(ks[0], (1, D), jnp.float32)
    p['logsig'] = jax.random.uniform(ks[1], (1, D), jnp.float32, -0.3, 0.3)
    p['ln_in_g'] = jnp.ones((1, D), jnp.float32)
    p['ln_in_b'] = jnp.zeros((1, D), jnp.float32)
    p['ln_sl_g'] = jnp.ones((1, D), jnp.float32)
    p['ln_sl_b'] = jnp.zeros((1, D), jnp.float32)
    p['ln_pre_g'] = jnp.ones((1, D), jnp.float32)
    p['ln_pre_b'] = jnp.zeros((1, D), jnp.float32)
    p['wq'], p['bq'] = lin(ks[2], D, D)
    p['wk'], p['bk'] = lin(ks[3], D, D)
    p['wv'], p['bv'] = lin(ks[4], D, D)
    # GRUCell: weight_ih/(hh) are (3D, D), gate order [r, z, n]
    s = 1.0 / math.sqrt(D)
    p['wih'] = jax.random.uniform(ks[5], (3 * D, D), jnp.float32, -s, s)
    p['whh'] = jax.random.uniform(ks[6], (3 * D, D), jnp.float32, -s, s)
    p['bih'] = jax.random.uniform(ks[7], (3 * D,), jnp.float32, -s, s)
    p['bhh'] = jax.random.uniform(ks[8], (3 * D,), jnp.float32, -s, s)
    p['w1'], p['b1'] = lin(ks[9], H, D)
    p['w2'], p['b2'] = lin(ks[10], D, H)
    p['wkeep'], _ = lin(ks[11], 2, D, bias=False)
    return p


def pack_params(p, dim, hidden_dim, compute_dtype=jnp.float32):
    """Pre-transpose / fuse weights into 3 slabs (vec slab, D-row weight slab, w2).

    compute_dtype sets the MXU-operand dtype of the weight slabs (f32 for
    numerics-faithful runs, bf16 for throughput once D scales up).
    """
    D, H = dim, hidden_dim
    scale = D ** -0.5

    # fold attention scale into q projection
    wq = p['wq'].T * scale
    bq = p['bq'] * scale

    # fused k|v projection
    wkv = jnp.concatenate([p['wk'].T, p['wv'].T], axis=1)            # (D, 2D)
    bkv = jnp.concatenate([p['bk'], p['bv']])

    # GRUCell split into two (D, 3D) matmuls (no concat, no zero blocks)
    w_gi = p['wih'].T                                                # (D, 3D)
    w_gh = p['whh'].T                                                # (D, 3D)

    w1 = p['w1'].T                                                   # (D, H)
    w2 = p['w2'].T                                                   # (H, D)
    wkeep = p['wkeep'].T                                             # (D, 2)

    vecs, vec_off = _pack_slab_1d([
        ('mu', p['mu']), ('logsig', p['logsig']),
        ('g_in', p['ln_in_g']), ('b_in', p['ln_in_b']),
        ('g_sl', p['ln_sl_g']), ('b_sl', p['ln_sl_b']),
        ('g_pre', p['ln_pre_g']), ('b_pre', p['ln_pre_b']),
        ('bq', bq), ('bkv', bkv),
        ('b_gi', p['bih']), ('b_gh', p['bhh']),
        ('b1', p['b1']), ('b2', p['b2']),
    ])
    w_a, w_off = _pack_slab_2d([
        ('wq', wq), ('wkv', wkv), ('w_gi', w_gi), ('w_gh', w_gh),
        ('w1', w1), ('wkeep', wkeep),
    ], dtype=compute_dtype)

    return dict(vecs=vecs, w_a=w_a, w2=jnp.asarray(w2, compute_dtype),
                vec_off=vec_off, w_off=w_off)


if __name__ == "__main__":
    # Small shapes: batch=2, tokens=16, dim=32, num_slots=4, mlp hidden=64, 3 iters.
    B, N, D, S, H = 2, 16, 32, 4, 64
    ITERS = 3
    TEMPERATURE = 1.0

    key = jax.random.PRNGKey(0)
    k_x, k_sn, k_gu, k_p = jax.random.split(key, 4)

    x = jax.random.normal(k_x, (B, N, D), jnp.float32)
    slot_noise = jax.random.normal(k_sn, (B, S, D), jnp.float32)    # slot-init gaussian
    gumbel_u = jax.random.uniform(k_gu, (B, S, 2), jnp.float32)     # gumbel uniforms

    torch_params = init_params(k_p, D, H)

    # --- f32 path (numerics-faithful), batch_block=1 -> grid=(2,) "parallel"
    #     (keeps both v7x TensorCores busy) ---
    packed_f32 = pack_params(torch_params, D, H, compute_dtype=jnp.float32)
    slots, keep_slots = adaptive_slot_forward(
        x, slot_noise, gumbel_u, packed_f32,
        iters=ITERS, eps=1e-8, temperature=TEMPERATURE, batch_block=1)
    slots = jax.block_until_ready(slots)
    keep_slots = jax.block_until_ready(keep_slots)

    assert slots.shape == (B, S, D) and slots.dtype == jnp.float32
    assert keep_slots.shape == (B, S) and keep_slots.dtype == jnp.float32
    assert bool(jnp.all(jnp.isfinite(slots)))
    # forward value of the straight-through gate is exactly 0/1
    assert bool(jnp.all((keep_slots == 0.0) | (keep_slots == 1.0)))

    # --- bf16 MXU-operand path, batch_block=B -> single grid step
    #     (v5e/v6e single-core config; all matmuls batch-stacked to 2x rows) ---
    packed_bf16 = pack_params(torch_params, D, H, compute_dtype=jnp.bfloat16)
    slots_bf, keep_bf = adaptive_slot_forward(
        x, slot_noise, gumbel_u, packed_bf16,
        iters=ITERS, eps=1e-8, temperature=TEMPERATURE, batch_block=B)
    slots_bf = jax.block_until_ready(slots_bf)
    keep_bf = jax.block_until_ready(keep_bf)
    assert slots_bf.shape == (B, S, D) and keep_bf.shape == (B, S)
    assert bool(jnp.all(jnp.isfinite(slots_bf)))
    assert bool(jnp.all((keep_bf == 0.0) | (keep_bf == 1.0)))

    print("KERNEL_OK")
</pallas_src>

<mosaic_0001>
module attributes {stable_mosaic.version = 11 : i64} {
  func.func @adaptive_slot_kernel(%arg0: i32, %arg1: memref<1x16x32xf32, #tpu.memory_space<vmem>>, %arg2: memref<1x4x32xf32, #tpu.memory_space<vmem>>, %arg3: memref<1x4x2xf32, #tpu.memory_space<vmem>>, %arg4: memref<1x1792xf32, #tpu.memory_space<vmem>>, %arg5: memref<32x768xf32, #tpu.memory_space<vmem>>, %arg6: memref<64x32xf32, #tpu.memory_space<vmem>>, %arg7: memref<1x4x32xf32, #tpu.memory_space<vmem>>, %arg8: memref<1x4x1xf32, #tpu.memory_space<vmem>>) attributes {dimension_semantics = [#tpu.dimension_semantics<parallel>], iteration_bounds = array<i64: 2>, scalar_prefetch = 0 : i64, scratch_operands = 0 : i64, tpu.core_type = #tpu.core_type<tc>, window_params = [{transform_indices = @transform_0, window_bounds = array<i64: 1, 16, 32>}, {transform_indices = @transform_1, window_bounds = array<i64: 1, 4, 32>}, {transform_indices = @transform_2, window_bounds = array<i64: 1, 4, 2>}, {pipeline_mode = #tpu.pipeline_mode<synchronous>, transform_indices = @transform_3, window_bounds = array<i64: 1, 1792>}, {pipeline_mode = #tpu.pipeline_mode<synchronous>, transform_indices = @transform_4, window_bounds = array<i64: 32, 768>}, {pipeline_mode = #tpu.pipeline_mode<synchronous>, transform_indices = @transform_5, window_bounds = array<i64: 64, 32>}, {transform_indices = @transform_6, window_bounds = array<i64: 1, 4, 32>}, {transform_indices = @transform_7, window_bounds = array<i64: 1, 4, 1>}]} {
    %c0 = arith.constant 0 : index
    %c0_0 = arith.constant 0 : index
    %0 = vector.load %arg4[%c0, %c0_0] : memref<1x1792xf32, #tpu.memory_space<vmem>>, vector<1x32xf32>
    %c0_1 = arith.constant 0 : index
    %c128 = arith.constant 128 : index
    %1 = vector.load %arg4[%c0_1, %c128] : memref<1x1792xf32, #tpu.memory_space<vmem>>, vector<1x32xf32>
    %2 = math.exp %1 : vector<1x32xf32>
    %c0_2 = arith.constant 0 : index
    %c256 = arith.constant 256 : index
    %3 = vector.load %arg4[%c0_2, %c256] : memref<1x1792xf32, #tpu.memory_space<vmem>>, vector<1x32xf32>
    %c0_3 = arith.constant 0 : index
    %c384 = arith.constant 384 : index
    %4 = vector.load %arg4[%c0_3, %c384] : memref<1x1792xf32, #tpu.memory_space<vmem>>, vector<1x32xf32>
    %c0_4 = arith.constant 0 : index
    %c512 = arith.constant 512 : index
    %5 = vector.load %arg4[%c0_4, %c512] : memref<1x1792xf32, #tpu.memory_space<vmem>>, vector<1x32xf32>
    %6 = vector.shape_cast %5 : vector<1x32xf32> to vector<1x32xf32>
    %7 = vector.broadcast %6 : vector<1x32xf32> to vector<4x32xf32>
    %c0_5 = arith.constant 0 : index
    %c640 = arith.constant 640 : index
    %8 = vector.load %arg4[%c0_5, %c640] : memref<1x1792xf32, #tpu.memory_space<vmem>>, vector<1x32xf32>
    %9 = vector.shape_cast %8 : vector<1x32xf32> to vector<1x32xf32>
    %10 = vector.broadcast %9 : vector<1x32xf32> to vector<4x32xf32>
    %c0_6 = arith.constant 0 : index
    %c768 = arith.constant 768 : index
    %11 = vector.load %arg4[%c0_6, %c768] : memref<1x1792xf32, #tpu.memory_space<vmem>>, vector<1x32xf32>
    %12 = vector.shape_cast %11 : vector<1x32xf32> to vector<1x32xf32>
    %13 = vector.broadcast %12 : vector<1x32xf32> to vector<4x32xf32>
    %c0_7 = arith.constant 0 : index
    %c896 = arith.constant 896 : index
    %14 = vector.load %arg4[%c0_7, %c896] : memref<1x1792xf32, #tpu.memory_space<vmem>>, vector<1x32xf32>
    %15 = vector.shape_cast %14 : vector<1x32xf32> to vector<1x32xf32>
    %16 = vector.broadcast %15 : vector<1x32xf32> to vector<4x32xf32>
    %c0_8 = arith.constant 0 : index
    %c1024 = arith.constant 1024 : index
    %17 = vector.load %arg4[%c0_8, %c1024] : memref<1x1792xf32, #tpu.memory_space<vmem>>, vector<1x32xf32>
    %18 = vector.shape_cast %17 : vector<1x32xf32> to vector<1x32xf32>
    %19 = vector.broadcast %18 : vector<1x32xf32> to vector<4x32xf32>
    %c0_9 = arith.constant 0 : index
    %c1152 = arith.constant 1152 : index
    %20 = vector.load %arg4[%c0_9, %c1152] : memref<1x1792xf32, #tpu.memory_space<vmem>>, vector<1x64xf32>
    %c0_10 = arith.constant 0 : index
    %c1280 = arith.constant 1280 : index
    %21 = vector.load %arg4[%c0_10, %c1280] : memref<1x1792xf32, #tpu.memory_space<vmem>>, vector<1x96xf32>
    %22 = vector.shape_cast %21 : vector<1x96xf32> to vector<1x96xf32>
    %23 = vector.broadcast %22 : vector<1x96xf32> to vector<4x96xf32>
    %c0_11 = arith.constant 0 : index
    %c1408 = arith.constant 1408 : index
    %24 = vector.load %arg4[%c0_11, %c1408] : memref<1x1792xf32, #tpu.memory_space<vmem>>, vector<1x96xf32>
    %25 = vector.shape_cast %24 : vector<1x96xf32> to vector<1x96xf32>
    %26 = vector.broadcast %25 : vector<1x96xf32> to vector<4x96xf32>
    %c0_12 = arith.constant 0 : index
    %c1536 = arith.constant 1536 : index
    %27 = vector.load %arg4[%c0_12, %c1536] : memref<1x1792xf32, #tpu.memory_space<vmem>>, vector<1x64xf32>
    %28 = vector.shape_cast %27 : vector<1x64xf32> to vector<1x64xf32>
    %29 = vector.broadcast %28 : vector<1x64xf32> to vector<4x64xf32>
    %c0_13 = arith.constant 0 : index
    %c1664 = arith.constant 1664 : index
    %30 = vector.load %arg4[%c0_13, %c1664] : memref<1x1792xf32, #tpu.memory_space<vmem>>, vector<1x32xf32>
    %31 = vector.shape_cast %30 : vector<1x32xf32> to vector<1x32xf32>
    %32 = vector.broadcast %31 : vector<1x32xf32> to vector<4x32xf32>
    %c0_14 = arith.constant 0 : index
    %c0_15 = arith.constant 0 : index
    %33 = vector.load %arg5[%c0_14, %c0_15] : memref<32x768xf32, #tpu.memory_space<vmem>>, vector<32x32xf32>
    %c0_16 = arith.constant 0 : index
    %c128_17 = arith.constant 128 : index
    %34 = vector.load %arg5[%c0_16, %c128_17] : memref<32x768xf32, #tpu.memory_space<vmem>>, vector<32x64xf32>
    %c0_18 = arith.constant 0 : index
    %c256_19 = arith.constant 256 : index
    %35 = vector.load %arg5[%c0_18, %c256_19] : memref<32x768xf32, #tpu.memory_space<vmem>>, vector<32x96xf32>
    %c0_20 = arith.constant 0 : index
    %c384_21 = arith.constant 384 : index
    %36 = vector.load %arg5[%c0_20, %c384_21] : memref<32x768xf32, #tpu.memory_space<vmem>>, vector<32x96xf32>
    %c0_22 = arith.constant 0 : index
    %c512_23 = arith.constant 512 : index
    %37 = vector.load %arg5[%c0_22, %c512_23] : memref<32x768xf32, #tpu.memory_space<vmem>>, vector<32x64xf32>
    %c0_24 = arith.constant 0 : index
    %c640_25 = arith.constant 640 : index
    %38 = vector.load %arg5[%c0_24, %c640_25] : memref<32x768xf32, #tpu.memory_space<vmem>>, vector<32x2xf32>
    %c0_26 = arith.constant 0 : index
    %c0_27 = arith.constant 0 : index
    %39 = vector.load %arg6[%c0_26, %c0_27] : memref<64x32xf32, #tpu.memory_space<vmem>>, vector<64x32xf32>
    %c0_28 = arith.constant 0 : index
    %c0_29 = arith.constant 0 : index
    %c0_30 = arith.constant 0 : index
    %40 = vector.load %arg1[%c0_28, %c0_29, %c0_30] : memref<1x16x32xf32, #tpu.memory_space<vmem>>, vector<1x16x32xf32>
    %41 = vector.shape_cast %40 : vector<1x16x32xf32> to vector<16x32xf32>
    %c0_31 = arith.constant 0 : index
    %c0_32 = arith.constant 0 : index
    %c0_33 = arith.constant 0 : index
    %42 = vector.load %arg2[%c0_31, %c0_32, %c0_33] : memref<1x4x32xf32, #tpu.memory_space<vmem>>, vector<1x4x32xf32>
    %43 = vector.shape_cast %42 : vector<1x4x32xf32> to vector<4x32xf32>
    %44 = vector.broadcast %2 : vector<1x32xf32> to vector<4x32xf32>
    %45 = arith.mulf %44, %43 : vector<4x32xf32>
    %46 = vector.broadcast %0 : vector<1x32xf32> to vector<4x32xf32>
    %47 = arith.addf %46, %45 : vector<4x32xf32>
    %cst = arith.constant dense<0.000000e+00> : vector<16xf32>
    %48 = vector.multi_reduction <add>, %41, %cst [1] : vector<16x32xf32> to vector<16xf32>
    %49 = vector.shape_cast %48 : vector<16xf32> to vector<16x1xf32>
    %cst_34 = arith.constant 3.200000e+01 : f32
    %50 = vector.broadcast %cst_34 : f32 to vector<16x1xf32>
    %51 = arith.divf %49, %50 : vector<16x1xf32>
    %52 = vector.broadcast %51 : vector<16x1xf32> to vector<16x32xf32>
    %53 = arith.subf %41, %52 : vector<16x32xf32>
    %54 = arith.mulf %53, %53 : vector<16x32xf32>
    %cst_35 = arith.constant dense<0.000000e+00> : vector<16xf32>
    %55 = vector.multi_reduction <add>, %54, %cst_35 [1] : vector<16x32xf32> to vector<16xf32>
    %56 = vector.shape_cast %55 : vector<16xf32> to vector<16x1xf32>
    %cst_36 = arith.constant 3.200000e+01 : f32
    %57 = vector.broadcast %cst_36 : f32 to vector<16x1xf32>
    %58 = arith.divf %56, %57 : vector<16x1xf32>
    %cst_37 = arith.constant 9.99999974E-6 : f32
    %59 = vector.broadcast %cst_37 : f32 to vector<16x1xf32>
    %60 = arith.addf %58, %59 : vector<16x1xf32>
    %61 = math.rsqrt %60 : vector<16x1xf32>
    %62 = vector.broadcast %61 : vector<16x1xf32> to vector<16x32xf32>
    %63 = arith.mulf %53, %62 : vector<16x32xf32>
    %64 = vector.broadcast %3 : vector<1x32xf32> to vector<16x32xf32>
    %65 = arith.mulf %63, %64 : vector<16x32xf32>
    %66 = vector.broadcast %4 : vector<1x32xf32> to vector<16x32xf32>
    %67 = arith.addf %65, %66 : vector<16x32xf32>
    %cst_38 = arith.constant dense<0.000000e+00> : vector<16x64xf32>
    %68 = tpu.matmul %67, %34, %cst_38 {dimension_numbers = #tpu.dot_dimension_numbers<[1], [0], [0], [1], [0, 0, 1, 1], [], []>} : vector<16x32xf32>, vector<32x64xf32>, vector<16x64xf32> -> vector<16x64xf32>
    %69 = vector.broadcast %20 : vector<1x64xf32> to vector<16x64xf32>
    %70 = arith.addf %68, %69 : vector<16x64xf32>
    %71 = vector.extract_strided_slice %70 {offsets = [0, 0], sizes = [16, 32], strides = [1, 1]} : vector<16x64xf32> to vector<16x32xf32>
    %72 = vector.shape_cast %71 : vector<16x32xf32> to vector<1x16x32xf32>
    %73 = vector.extract_strided_slice %70 {offsets = [0, 32], sizes = [16, 32], strides = [1, 1]} : vector<16x64xf32> to vector<16x32xf32>
    %74 = vector.shape_cast %73 : vector<16x32xf32> to vector<1x16x32xf32>
    %cst_39 = arith.constant dense<0.000000e+00> : vector<4xf32>
    %75 = vector.multi_reduction <add>, %47, %cst_39 [1] : vector<4x32xf32> to vector<4xf32>
    %76 = vector.shape_cast %75 : vector<4xf32> to vector<4x1xf32>
    %cst_40 = arith.constant 3.200000e+01 : f32
    %77 = vector.broadcast %cst_40 : f32 to vector<4x1xf32>
    %78 = arith.divf %76, %77 : vector<4x1xf32>
    %79 = vector.broadcast %78 : vector<4x1xf32> to vector<4x32xf32>
    %80 = arith.subf %47, %79 : vector<4x32xf32>
    %81 = arith.mulf %80, %80 : vector<4x32xf32>
    %cst_41 = arith.constant dense<0.000000e+00> : vector<4xf32>
    %82 = vector.multi_reduction <add>, %81, %cst_41 [1] : vector<4x32xf32> to vector<4xf32>
    %83 = vector.shape_cast %82 : vector<4xf32> to vector<4x1xf32>
    %cst_42 = arith.constant 3.200000e+01 : f32
    %84 = vector.broadcast %cst_42 : f32 to vector<4x1xf32>
    %85 = arith.divf %83, %84 : vector<4x1xf32>
    %cst_43 = arith.constant 9.99999974E-6 : f32
    %86 = vector.broadcast %cst_43 : f32 to vector<4x1xf32>
    %87 = arith.addf %85, %86 : vector<4x1xf32>
    %88 = math.rsqrt %87 : vector<4x1xf32>
    %89 = vector.broadcast %88 : vector<4x1xf32> to vector<4x32xf32>
    %90 = arith.mulf %80, %89 : vector<4x32xf32>
    %91 = arith.mulf %90, %7 : vector<4x32xf32>
    %92 = arith.addf %91, %10 : vector<4x32xf32>
    %cst_44 = arith.constant dense<0.000000e+00> : vector<4x32xf32>
    %93 = tpu.matmul %92, %33, %cst_44 {dimension_numbers = #tpu.dot_dimension_numbers<[1], [0], [0], [1], [0, 0, 1, 1], [], []>} : vector<4x32xf32>, vector<32x32xf32>, vector<4x32xf32> -> vector<4x32xf32>
    %94 = arith.addf %93, %19 : vector<4x32xf32>
    %95 = vector.shape_cast %94 : vector<4x32xf32> to vector<1x4x32xf32>
    "tpu.trace_start"() <{level = 10 : i32, message = "bsd,bnd->bsn"}> : () -> ()
    %cst_45 = arith.constant dense<0.000000e+00> : vector<1x4x16xf32>
    %96 = tpu.matmul %95, %72, %cst_45 {dimension_numbers = #tpu.dot_dimension_numbers<[2], [2], [1], [1], [0, 0, 0, 1, 1, 1], [0], [0]>} : vector<1x4x32xf32>, vector<1x16x32xf32>, vector<1x4x16xf32> -> vector<1x4x16xf32>
    "tpu.trace_stop"() : () -> ()
    %cst_46 = arith.constant dense<0xFF800000> : vector<1x16xf32>
    %97 = vector.multi_reduction <maximumf>, %96, %cst_46 [1] : vector<1x4x16xf32> to vector<1x16xf32>
    %98 = vector.shape_cast %97 : vector<1x16xf32> to vector<1x1x16xf32>
    %99 = vector.broadcast %98 : vector<1x1x16xf32> to vector<1x4x16xf32>
    %100 = arith.subf %96, %99 : vector<1x4x16xf32>
    %101 = math.exp %100 : vector<1x4x16xf32>
    %cst_47 = arith.constant dense<0.000000e+00> : vector<1x16xf32>
    %102 = vector.multi_reduction <add>, %101, %cst_47 [1] : vector<1x4x16xf32> to vector<1x16xf32>
    %103 = vector.shape_cast %102 : vector<1x16xf32> to vector<1x1x16xf32>
    %104 = vector.broadcast %103 : vector<1x1x16xf32> to vector<1x4x16xf32>
    %105 = arith.divf %101, %104 : vector<1x4x16xf32>
    %cst_48 = arith.constant 9.99999993E-9 : f32
    %106 = vector.broadcast %cst_48 : f32 to vector<1x4x16xf32>
    %107 = arith.addf %105, %106 : vector<1x4x16xf32>
    %cst_49 = arith.constant dense<0.000000e+00> : vector<1x4xf32>
    %108 = vector.multi_reduction <add>, %107, %cst_49 [2] : vector<1x4x16xf32> to vector<1x4xf32>
    %109 = vector.shape_cast %108 : vector<1x4xf32> to vector<1x4x1xf32>
    %110 = vector.broadcast %109 : vector<1x4x1xf32> to vector<1x4x16xf32>
    %111 = arith.divf %107, %110 : vector<1x4x16xf32>
    "tpu.trace_start"() <{level = 10 : i32, message = "bsn,bnd->bsd"}> : () -> ()
    %cst_50 = arith.constant dense<0.000000e+00> : vector<1x4x32xf32>
    %112 = tpu.matmul %111, %74, %cst_50 {dimension_numbers = #tpu.dot_dimension_numbers<[2], [1], [1], [2], [0, 0, 0, 1, 1, 2], [0], [0]>} : vector<1x4x16xf32>, vector<1x16x32xf32>, vector<1x4x32xf32> -> vector<1x4x32xf32>
    "tpu.trace_stop"() : () -> ()
    %113 = vector.shape_cast %112 : vector<1x4x32xf32> to vector<4x32xf32>
    %cst_51 = arith.constant dense<0.000000e+00> : vector<4x96xf32>
    %114 = tpu.matmul %113, %35, %cst_51 {dimension_numbers = #tpu.dot_dimension_numbers<[1], [0], [0], [1], [0, 0, 1, 1], [], []>} : vector<4x32xf32>, vector<32x96xf32>, vector<4x96xf32> -> vector<4x96xf32>
    %115 = arith.addf %114, %23 : vector<4x96xf32>
    %cst_52 = arith.constant dense<0.000000e+00> : vector<4x96xf32>
    %116 = tpu.matmul %47, %36, %cst_52 {dimension_numbers = #tpu.dot_dimension_numbers<[1], [0], [0], [1], [0, 0, 1, 1], [], []>} : vector<4x32xf32>, vector<32x96xf32>, vector<4x96xf32> -> vector<4x96xf32>
    %117 = arith.addf %116, %26 : vector<4x96xf32>
    %118 = vector.extract_strided_slice %115 {offsets = [0, 0], sizes = [4, 32], strides = [1, 1]} : vector<4x96xf32> to vector<4x32xf32>
    %119 = vector.extract_strided_slice %117 {offsets = [0, 0], sizes = [4, 32], strides = [1, 1]} : vector<4x96xf32> to vector<4x32xf32>
    %120 = arith.addf %118, %119 : vector<4x32xf32>
    %121 = arith.negf %120 : vector<4x32xf32>
    %122 = math.exp %121 : vector<4x32xf32>
    %cst_53 = arith.constant 1.000000e+00 : f32
    %123 = vector.broadcast %cst_53 : f32 to vector<4x32xf32>
    %124 = arith.addf %123, %122 : vector<4x32xf32>
    %125 = arith.divf %123, %124 : vector<4x32xf32>
    %126 = vector.extract_strided_slice %115 {offsets = [0, 32], sizes = [4, 32], strides = [1, 1]} : vector<4x96xf32> to vector<4x32xf32>
    %127 = vector.extract_strided_slice %117 {offsets = [0, 32], sizes = [4, 32], strides = [1, 1]} : vector<4x96xf32> to vector<4x32xf32>
    %128 = arith.addf %126, %127 : vector<4x32xf32>
    %129 = arith.negf %128 : vector<4x32xf32>
    %130 = math.exp %129 : vector<4x32xf32>
    %cst_54 = arith.constant 1.000000e+00 : f32
    %131 = vector.broadcast %cst_54 : f32 to vector<4x32xf32>
    %132 = arith.addf %131, %130 : vector<4x32xf32>
    %133 = arith.divf %131, %132 : vector<4x32xf32>
    %134 = vector.extract_strided_slice %115 {offsets = [0, 64], sizes = [4, 32], strides = [1, 1]} : vector<4x96xf32> to vector<4x32xf32>
    %135 = vector.extract_strided_slice %117 {offsets = [0, 64], sizes = [4, 32], strides = [1, 1]} : vector<4x96xf32> to vector<4x32xf32>
    %136 = arith.mulf %125, %135 : vector<4x32xf32>
    %137 = arith.addf %134, %136 : vector<4x32xf32>
    %138 = math.tanh %137 : vector<4x32xf32>
    %cst_55 = arith.constant 1.000000e+00 : f32
    %139 = vector.broadcast %cst_55 : f32 to vector<4x32xf32>
    %140 = arith.subf %139, %133 : vector<4x32xf32>
    %141 = arith.mulf %140, %138 : vector<4x32xf32>
    %142 = arith.mulf %133, %47 : vector<4x32xf32>
    %143 = arith.addf %141, %142 : vector<4x32xf32>
    %cst_56 = arith.constant dense<0.000000e+00> : vector<4xf32>
    %144 = vector.multi_reduction <add>, %143, %cst_56 [1] : vector<4x32xf32> to vector<4xf32>
    %145 = vector.shape_cast %144 : vector<4xf32> to vector<4x1xf32>
    %cst_57 = arith.constant 3.200000e+01 : f32
    %146 = vector.broadcast %cst_57 : f32 to vector<4x1xf32>
    %147 = arith.divf %145, %146 : vector<4x1xf32>
    %148 = vector.broadcast %147 : vector<4x1xf32> to vector<4x32xf32>
    %149 = arith.subf %143, %148 : vector<4x32xf32>
    %150 = arith.mulf %149, %149 : vector<4x32xf32>
    %cst_58 = arith.constant dense<0.000000e+00> : vector<4xf32>
    %151 = vector.multi_reduction <add>, %150, %cst_58 [1] : vector<4x32xf32> to vector<4xf32>
    %152 = vector.shape_cast %151 : vector<4xf32> to vector<4x1xf32>
    %cst_59 = arith.constant 3.200000e+01 : f32
    %153 = vector.broadcast %cst_59 : f32 to vector<4x1xf32>
    %154 = arith.divf %152, %153 : vector<4x1xf32>
    %cst_60 = arith.constant 9.99999974E-6 : f32
    %155 = vector.broadcast %cst_60 : f32 to vector<4x1xf32>
    %156 = arith.addf %154, %155 : vector<4x1xf32>
    %157 = math.rsqrt %156 : vector<4x1xf32>
    %158 = vector.broadcast %157 : vector<4x1xf32> to vector<4x32xf32>
    %159 = arith.mulf %149, %158 : vector<4x32xf32>
    %160 = arith.mulf %159, %13 : vector<4x32xf32>
    %161 = arith.addf %160, %16 : vector<4x32xf32>
    %cst_61 = arith.constant dense<0.000000e+00> : vector<4x64xf32>
    %162 = tpu.matmul %161, %37, %cst_61 {dimension_numbers = #tpu.dot_dimension_numbers<[1], [0], [0], [1], [0, 0, 1, 1], [], []>} : vector<4x32xf32>, vector<32x64xf32>, vector<4x64xf32> -> vector<4x64xf32>
    %163 = arith.addf %162, %29 : vector<4x64xf32>
    %cst_62 = arith.constant 0.000000e+00 : f32
    %164 = vector.broadcast %cst_62 : f32 to vector<4x64xf32>
    %165 = arith.maximumf %163, %164 : vector<4x64xf32>
    %cst_63 = arith.constant dense<0.000000e+00> : vector<4x32xf32>
    %166 = tpu.matmul %165, %39, %cst_63 {dimension_numbers = #tpu.dot_dimension_numbers<[1], [0], [0], [1], [0, 0, 1, 1], [], []>} : vector<4x64xf32>, vector<64x32xf32>, vector<4x32xf32> -> vector<4x32xf32>
    %167 = arith.addf %143, %166 : vector<4x32xf32>
    %168 = arith.addf %167, %32 : vector<4x32xf32>
    %cst_64 = arith.constant dense<0.000000e+00> : vector<4xf32>
    %169 = vector.multi_reduction <add>, %168, %cst_64 [1] : vector<4x32xf32> to vector<4xf32>
    %170 = vector.shape_cast %169 : vector<4xf32> to vector<4x1xf32>
    %cst_65 = arith.constant 3.200000e+01 : f32
    %171 = vector.broadcast %cst_65 : f32 to vector<4x1xf32>
    %172 = arith.divf %170, %171 : vector<4x1xf32>
    %173 = vector.broadcast %172 : vector<4x1xf32> to vector<4x32xf32>
    %174 = arith.subf %168, %173 : vector<4x32xf32>
    %175 = arith.mulf %174, %174 : vector<4x32xf32>
    %cst_66 = arith.constant dense<0.000000e+00> : vector<4xf32>
    %176 = vector.multi_reduction <add>, %175, %cst_66 [1] : vector<4x32xf32> to vector<4xf32>
    %177 = vector.shape_cast %176 : vector<4xf32> to vector<4x1xf32>
    %cst_67 = arith.constant 3.200000e+01 : f32
    %178 = vector.broadcast %cst_67 : f32 to vector<4x1xf32>
    %179 = arith.divf %177, %178 : vector<4x1xf32>
    %cst_68 = arith.constant 9.99999974E-6 : f32
    %180 = vector.broadcast %cst_68 : f32 to vector<4x1xf32>
    %181 = arith.addf %179, %180 : vector<4x1xf32>
    %182 = math.rsqrt %181 : vector<4x1xf32>
    %183 = vector.broadcast %182 : vector<4x1xf32> to vector<4x32xf32>
    %184 = arith.mulf %174, %183 : vector<4x32xf32>
    %185 = arith.mulf %184, %7 : vector<4x32xf32>
    %186 = arith.addf %185, %10 : vector<4x32xf32>
    %cst_69 = arith.constant dense<0.000000e+00> : vector<4x32xf32>
    %187 = tpu.matmul %186, %33, %cst_69 {dimension_numbers = #tpu.dot_dimension_numbers<[1], [0], [0], [1], [0, 0, 1, 1], [], []>} : vector<4x32xf32>, vector<32x32xf32>, vector<4x32xf32> -> vector<4x32xf32>
    %188 = arith.addf %187, %19 : vector<4x32xf32>
    %189 = vector.shape_cast %188 : vector<4x32xf32> to vector<1x4x32xf32>
    "tpu.trace_start"() <{level = 10 : i32, message = "bsd,bnd->bsn"}> : () -> ()
    %cst_70 = arith.constant dense<0.000000e+00> : vector<1x4x16xf32>
    %190 = tpu.matmul %189, %72, %cst_70 {dimension_numbers = #tpu.dot_dimension_numbers<[2], [2], [1], [1], [0, 0, 0, 1, 1, 1], [0], [0]>} : vector<1x4x32xf32>, vector<1x16x32xf32>, vector<1x4x16xf32> -> vector<1x4x16xf32>
    "tpu.trace_stop"() : () -> ()
    %cst_71 = arith.constant dense<0xFF800000> : vector<1x16xf32>
    %191 = vector.multi_reduction <maximumf>, %190, %cst_71 [1] : vector<1x4x16xf32> to vector<1x16xf32>
    %192 = vector.shape_cast %191 : vector<1x16xf32> to vector<1x1x16xf32>
    %193 = vector.broadcast %192 : vector<1x1x16xf32> to vector<1x4x16xf32>
    %194 = arith.subf %190, %193 : vector<1x4x16xf32>
    %195 = math.exp %194 : vector<1x4x16xf32>
    %cst_72 = arith.constant dense<0.000000e+00> : vector<1x16xf32>
    %196 = vector.multi_reduction <add>, %195, %cst_72 [1] : vector<1x4x16xf32> to vector<1x16xf32>
    %197 = vector.shape_cast %196 : vector<1x16xf32> to vector<1x1x16xf32>
    %198 = vector.broadcast %197 : vector<1x1x16xf32> to vector<1x4x16xf32>
    %199 = arith.divf %195, %198 : vector<1x4x16xf32>
    %cst_73 = arith.constant 9.99999993E-9 : f32
    %200 = vector.broadcast %cst_73 : f32 to vector<1x4x16xf32>
    %201 = arith.addf %199, %200 : vector<1x4x16xf32>
    %cst_74 = arith.constant dense<0.000000e+00> : vector<1x4xf32>
    %202 = vector.multi_reduction <add>, %201, %cst_74 [2] : vector<1x4x16xf32> to vector<1x4xf32>
    %203 = vector.shape_cast %202 : vector<1x4xf32> to vector<1x4x1xf32>
    %204 = vector.broadcast %203 : vector<1x4x1xf32> to vector<1x4x16xf32>
    %205 = arith.divf %201, %204 : vector<1x4x16xf32>
    "tpu.trace_start"() <{level = 10 : i32, message = "bsn,bnd->bsd"}> : () -> ()
    %cst_75 = arith.constant dense<0.000000e+00> : vector<1x4x32xf32>
    %206 = tpu.matmul %205, %74, %cst_75 {dimension_numbers = #tpu.dot_dimension_numbers<[2], [1], [1], [2], [0, 0, 0, 1, 1, 2], [0], [0]>} : vector<1x4x16xf32>, vector<1x16x32xf32>, vector<1x4x32xf32> -> vector<1x4x32xf32>
    "tpu.trace_stop"() : () -> ()
    %207 = vector.shape_cast %206 : vector<1x4x32xf32> to vector<4x32xf32>
    %cst_76 = arith.constant dense<0.000000e+00> : vector<4x96xf32>
    %208 = tpu.matmul %207, %35, %cst_76 {dimension_numbers = #tpu.dot_dimension_numbers<[1], [0], [0], [1], [0, 0, 1, 1], [], []>} : vector<4x32xf32>, vector<32x96xf32>, vector<4x96xf32> -> vector<4x96xf32>
    %209 = arith.addf %208, %23 : vector<4x96xf32>
    %cst_77 = arith.constant dense<0.000000e+00> : vector<4x96xf32>
    %210 = tpu.matmul %168, %36, %cst_77 {dimension_numbers = #tpu.dot_dimension_numbers<[1], [0], [0], [1], [0, 0, 1, 1], [], []>} : vector<4x32xf32>, vector<32x96xf32>, vector<4x96xf32> -> vector<4x96xf32>
    %211 = arith.addf %210, %26 : vector<4x96xf32>
    %212 = vector.extract_strided_slice %209 {offsets = [0, 0], sizes = [4, 32], strides = [1, 1]} : vector<4x96xf32> to vector<4x32xf32>
    %213 = vector.extract_strided_slice %211 {offsets = [0, 0], sizes = [4, 32], strides = [1, 1]} : vector<4x96xf32> to vector<4x32xf32>
    %214 = arith.addf %212, %213 : vector<4x32xf32>
    %215 = arith.negf %214 : vector<4x32xf32>
    %216 = math.exp %215 : vector<4x32xf32>
    %cst_78 = arith.constant 1.000000e+00 : f32
    %217 = vector.broadcast %cst_78 : f32 to vector<4x32xf32>
    %218 = arith.addf %217, %216 : vector<4x32xf32>
    %219 = arith.divf %217, %218 : vector<4x32xf32>
    %220 = vector.extract_strided_slice %209 {offsets = [0, 32], sizes = [4, 32], strides = [1, 1]} : vector<4x96xf32> to vector<4x32xf32>
    %221 = vector.extract_strided_slice %211 {offsets = [0, 32], sizes = [4, 32], strides = [1, 1]} : vector<4x96xf32> to vector<4x32xf32>
    %222 = arith.addf %220, %221 : vector<4x32xf32>
    %223 = arith.negf %222 : vector<4x32xf32>
    %224 = math.exp %223 : vector<4x32xf32>
    %cst_79 = arith.constant 1.000000e+00 : f32
    %225 = vector.broadcast %cst_79 : f32 to vector<4x32xf32>
    %226 = arith.addf %225, %224 : vector<4x32xf32>
    %227 = arith.divf %225, %226 : vector<4x32xf32>
    %228 = vector.extract_strided_slice %209 {offsets = [0, 64], sizes = [4, 32], strides = [1, 1]} : vector<4x96xf32> to vector<4x32xf32>
    %229 = vector.extract_strided_slice %211 {offsets = [0, 64], sizes = [4, 32], strides = [1, 1]} : vector<4x96xf32> to vector<4x32xf32>
    %230 = arith.mulf %219, %229 : vector<4x32xf32>
    %231 = arith.addf %228, %230 : vector<4x32xf32>
    %232 = math.tanh %231 : vector<4x32xf32>
    %cst_80 = arith.constant 1.000000e+00 : f32
    %233 = vector.broadcast %cst_80 : f32 to vector<4x32xf32>
    %234 = arith.subf %233, %227 : vector<4x32xf32>
    %235 = arith.mulf %234, %232 : vector<4x32xf32>
    %236 = arith.mulf %227, %168 : vector<4x32xf32>
    %237 = arith.addf %235, %236 : vector<4x32xf32>
    %cst_81 = arith.constant dense<0.000000e+00> : vector<4xf32>
    %238 = vector.multi_reduction <add>, %237, %cst_81 [1] : vector<4x32xf32> to vector<4xf32>
    %239 = vector.shape_cast %238 : vector<4xf32> to vector<4x1xf32>
    %cst_82 = arith.constant 3.200000e+01 : f32
    %240 = vector.broadcast %cst_82 : f32 to vector<4x1xf32>
    %241 = arith.divf %239, %240 : vector<4x1xf32>
    %242 = vector.broadcast %241 : vector<4x1xf32> to vector<4x32xf32>
    %243 = arith.subf %237, %242 : vector<4x32xf32>
    %244 = arith.mulf %243, %243 : vector<4x32xf32>
    %cst_83 = arith.constant dense<0.000000e+00> : vector<4xf32>
    %245 = vector.multi_reduction <add>, %244, %cst_83 [1] : vector<4x32xf32> to vector<4xf32>
    %246 = vector.shape_cast %245 : vector<4xf32> to vector<4x1xf32>
    %cst_84 = arith.constant 3.200000e+01 : f32
    %247 = vector.broadcast %cst_84 : f32 to vector<4x1xf32>
    %248 = arith.divf %246, %247 : vector<4x1xf32>
    %cst_85 = arith.constant 9.99999974E-6 : f32
    %249 = vector.broadcast %cst_85 : f32 to vector<4x1xf32>
    %250 = arith.addf %248, %249 : vector<4x1xf32>
    %251 = math.rsqrt %250 : vector<4x1xf32>
    %252 = vector.broadcast %251 : vector<4x1xf32> to vector<4x32xf32>
    %253 = arith.mulf %243, %252 : vector<4x32xf32>
    %254 = arith.mulf %253, %13 : vector<4x32xf32>
    %255 = arith.addf %254, %16 : vector<4x32xf32>
    %cst_86 = arith.constant dense<0.000000e+00> : vector<4x64xf32>
    %256 = tpu.matmul %255, %37, %cst_86 {dimension_numbers = #tpu.dot_dimension_numbers<[1], [0], [0], [1], [0, 0, 1, 1], [], []>} : vector<4x32xf32>, vector<32x64xf32>, vector<4x64xf32> -> vector<4x64xf32>
    %257 = arith.addf %256, %29 : vector<4x64xf32>
    %cst_87 = arith.constant 0.000000e+00 : f32
    %258 = vector.broadcast %cst_87 : f32 to vector<4x64xf32>
    %259 = arith.maximumf %257, %258 : vector<4x64xf32>
    %cst_88 = arith.constant dense<0.000000e+00> : vector<4x32xf32>
    %260 = tpu.matmul %259, %39, %cst_88 {dimension_numbers = #tpu.dot_dimension_numbers<[1], [0], [0], [1], [0, 0, 1, 1], [], []>} : vector<4x64xf32>, vector<64x32xf32>, vector<4x32xf32> -> vector<4x32xf32>
    %261 = arith.addf %237, %260 : vector<4x32xf32>
    %262 = arith.addf %261, %32 : vector<4x32xf32>
    %cst_89 = arith.constant dense<0.000000e+00> : vector<4xf32>
    %263 = vector.multi_reduction <add>, %262, %cst_89 [1] : vector<4x32xf32> to vector<4xf32>
    %264 = vector.shape_cast %263 : vector<4xf32> to vector<4x1xf32>
    %cst_90 = arith.constant 3.200000e+01 : f32
    %265 = vector.broadcast %cst_90 : f32 to vector<4x1xf32>
    %266 = arith.divf %264, %265 : vector<4x1xf32>
    %267 = vector.broadcast %266 : vector<4x1xf32> to vector<4x32xf32>
    %268 = arith.subf %262, %267 : vector<4x32xf32>
    %269 = arith.mulf %268, %268 : vector<4x32xf32>
    %cst_91 = arith.constant dense<0.000000e+00> : vector<4xf32>
    %270 = vector.multi_reduction <add>, %269, %cst_91 [1] : vector<4x32xf32> to vector<4xf32>
    %271 = vector.shape_cast %270 : vector<4xf32> to vector<4x1xf32>
    %cst_92 = arith.constant 3.200000e+01 : f32
    %272 = vector.broadcast %cst_92 : f32 to vector<4x1xf32>
    %273 = arith.divf %271, %272 : vector<4x1xf32>
    %cst_93 = arith.constant 9.99999974E-6 : f32
    %274 = vector.broadcast %cst_93 : f32 to vector<4x1xf32>
    %275 = arith.addf %273, %274 : vector<4x1xf32>
    %276 = math.rsqrt %275 : vector<4x1xf32>
    %277 = vector.broadcast %276 : vector<4x1xf32> to vector<4x32xf32>
    %278 = arith.mulf %268, %277 : vector<4x32xf32>
    %279 = arith.mulf %278, %7 : vector<4x32xf32>
    %280 = arith.addf %279, %10 : vector<4x32xf32>
    %cst_94 = arith.constant dense<0.000000e+00> : vector<4x32xf32>
    %281 = tpu.matmul %280, %33, %cst_94 {dimension_numbers = #tpu.dot_dimension_numbers<[1], [0], [0], [1], [0, 0, 1, 1], [], []>} : vector<4x32xf32>, vector<32x32xf32>, vector<4x32xf32> -> vector<4x32xf32>
    %282 = arith.addf %281, %19 : vector<4x32xf32>
    %283 = vector.shape_cast %282 : vector<4x32xf32> to vector<1x4x32xf32>
    "tpu.trace_start"() <{level = 10 : i32, message = "bsd,bnd->bsn"}> : () -> ()
    %cst_95 = arith.constant dense<0.000000e+00> : vector<1x4x16xf32>
    %284 = tpu.matmul %283, %72, %cst_95 {dimension_numbers = #tpu.dot_dimension_numbers<[2], [2], [1], [1], [0, 0, 0, 1, 1, 1], [0], [0]>} : vector<1x4x32xf32>, vector<1x16x32xf32>, vector<1x4x16xf32> -> vector<1x4x16xf32>
    "tpu.trace_stop"() : () -> ()
    %cst_96 = arith.constant dense<0xFF800000> : vector<1x16xf32>
    %285 = vector.multi_reduction <maximumf>, %284, %cst_96 [1] : vector<1x4x16xf32> to vector<1x16xf32>
    %286 = vector.shape_cast %285 : vector<1x16xf32> to vector<1x1x16xf32>
    %287 = vector.broadcast %286 : vector<1x1x16xf32> to vector<1x4x16xf32>
    %288 = arith.subf %284, %287 : vector<1x4x16xf32>
    %289 = math.exp %288 : vector<1x4x16xf32>
    %cst_97 = arith.constant dense<0.000000e+00> : vector<1x16xf32>
    %290 = vector.multi_reduction <add>, %289, %cst_97 [1] : vector<1x4x16xf32> to vector<1x16xf32>
    %291 = vector.shape_cast %290 : vector<1x16xf32> to vector<1x1x16xf32>
    %292 = vector.broadcast %291 : vector<1x1x16xf32> to vector<1x4x16xf32>
    %293 = arith.divf %289, %292 : vector<1x4x16xf32>
    %cst_98 = arith.constant 9.99999993E-9 : f32
    %294 = vector.broadcast %cst_98 : f32 to vector<1x4x16xf32>
    %295 = arith.addf %293, %294 : vector<1x4x16xf32>
    %cst_99 = arith.constant dense<0.000000e+00> : vector<1x4xf32>
    %296 = vector.multi_reduction <add>, %295, %cst_99 [2] : vector<1x4x16xf32> to vector<1x4xf32>
    %297 = vector.shape_cast %296 : vector<1x4xf32> to vector<1x4x1xf32>
    %298 = vector.broadcast %297 : vector<1x4x1xf32> to vector<1x4x16xf32>
    %299 = arith.divf %295, %298 : vector<1x4x16xf32>
    "tpu.trace_start"() <{level = 10 : i32, message = "bsn,bnd->bsd"}> : () -> ()
    %cst_100 = arith.constant dense<0.000000e+00> : vector<1x4x32xf32>
    %300 = tpu.matmul %299, %74, %cst_100 {dimension_numbers = #tpu.dot_dimension_numbers<[2], [1], [1], [2], [0, 0, 0, 1, 1, 2], [0], [0]>} : vector<1x4x16xf32>, vector<1x16x32xf32>, vector<1x4x32xf32> -> vector<1x4x32xf32>
    "tpu.trace_stop"() : () -> ()
    %301 = vector.shape_cast %300 : vector<1x4x32xf32> to vector<4x32xf32>
    %cst_101 = arith.constant dense<0.000000e+00> : vector<4x96xf32>
    %302 = tpu.matmul %301, %35, %cst_101 {dimension_numbers = #tpu.dot_dimension_numbers<[1], [0], [0], [1], [0, 0, 1, 1], [], []>} : vector<4x32xf32>, vector<32x96xf32>, vector<4x96xf32> -> vector<4x96xf32>
    %303 = arith.addf %302, %23 : vector<4x96xf32>
    %cst_102 = arith.constant dense<0.000000e+00> : vector<4x96xf32>
    %304 = tpu.matmul %262, %36, %cst_102 {dimension_numbers = #tpu.dot_dimension_numbers<[1], [0], [0], [1], [0, 0, 1, 1], [], []>} : vector<4x32xf32>, vector<32x96xf32>, vector<4x96xf32> -> vector<4x96xf32>
    %305 = arith.addf %304, %26 : vector<4x96xf32>
    %306 = vector.extract_strided_slice %303 {offsets = [0, 0], sizes = [4, 32], strides = [1, 1]} : vector<4x96xf32> to vector<4x32xf32>
    %307 = vector.extract_strided_slice %305 {offsets = [0, 0], sizes = [4, 32], strides = [1, 1]} : vector<4x96xf32> to vector<4x32xf32>
    %308 = arith.addf %306, %307 : vector<4x32xf32>
    %309 = arith.negf %308 : vector<4x32xf32>
    %310 = math.exp %309 : vector<4x32xf32>
    %cst_103 = arith.constant 1.000000e+00 : f32
    %311 = vector.broadcast %cst_103 : f32 to vector<4x32xf32>
    %312 = arith.addf %311, %310 : vector<4x32xf32>
    %313 = arith.divf %311, %312 : vector<4x32xf32>
    %314 = vector.extract_strided_slice %303 {offsets = [0, 32], sizes = [4, 32], strides = [1, 1]} : vector<4x96xf32> to vector<4x32xf32>
    %315 = vector.extract_strided_slice %305 {offsets = [0, 32], sizes = [4, 32], strides = [1, 1]} : vector<4x96xf32> to vector<4x32xf32>
    %316 = arith.addf %314, %315 : vector<4x32xf32>
    %317 = arith.negf %316 : vector<4x32xf32>
    %318 = math.exp %317 : vector<4x32xf32>
    %cst_104 = arith.constant 1.000000e+00 : f32
    %319 = vector.broadcast %cst_104 : f32 to vector<4x32xf32>
    %320 = arith.addf %319, %318 : vector<4x32xf32>
    %321 = arith.divf %319, %320 : vector<4x32xf32>
    %322 = vector.extract_strided_slice %303 {offsets = [0, 64], sizes = [4, 32], strides = [1, 1]} : vector<4x96xf32> to vector<4x32xf32>
    %323 = vector.extract_strided_slice %305 {offsets = [0, 64], sizes = [4, 32], strides = [1, 1]} : vector<4x96xf32> to vector<4x32xf32>
    %324 = arith.mulf %313, %323 : vector<4x32xf32>
    %325 = arith.addf %322, %324 : vector<4x32xf32>
    %326 = math.tanh %325 : vector<4x32xf32>
    %cst_105 = arith.constant 1.000000e+00 : f32
    %327 = vector.broadcast %cst_105 : f32 to vector<4x32xf32>
    %328 = arith.subf %327, %321 : vector<4x32xf32>
    %329 = arith.mulf %328, %326 : vector<4x32xf32>
    %330 = arith.mulf %321, %262 : vector<4x32xf32>
    %331 = arith.addf %329, %330 : vector<4x32xf32>
    %cst_106 = arith.constant dense<0.000000e+00> : vector<4xf32>
    %332 = vector.multi_reduction <add>, %331, %cst_106 [1] : vector<4x32xf32> to vector<4xf32>
    %333 = vector.shape_cast %332 : vector<4xf32> to vector<4x1xf32>
    %cst_107 = arith.constant 3.200000e+01 : f32
    %334 = vector.broadcast %cst_107 : f32 to vector<4x1xf32>
    %335 = arith.divf %333, %334 : vector<4x1xf32>
    %336 = vector.broadcast %335 : vector<4x1xf32> to vector<4x32xf32>
    %337 = arith.subf %331, %336 : vector<4x32xf32>
    %338 = arith.mulf %337, %337 : vector<4x32xf32>
    %cst_108 = arith.constant dense<0.000000e+00> : vector<4xf32>
    %339 = vector.multi_reduction <add>, %338, %cst_108 [1] : vector<4x32xf32> to vector<4xf32>
    %340 = vector.shape_cast %339 : vector<4xf32> to vector<4x1xf32>
    %cst_109 = arith.constant 3.200000e+01 : f32
    %341 = vector.broadcast %cst_109 : f32 to vector<4x1xf32>
    %342 = arith.divf %340, %341 : vector<4x1xf32>
    %cst_110 = arith.constant 9.99999974E-6 : f32
    %343 = vector.broadcast %cst_110 : f32 to vector<4x1xf32>
    %344 = arith.addf %342, %343 : vector<4x1xf32>
    %345 = math.rsqrt %344 : vector<4x1xf32>
    %346 = vector.broadcast %345 : vector<4x1xf32> to vector<4x32xf32>
    %347 = arith.mulf %337, %346 : vector<4x32xf32>
    %348 = arith.mulf %347, %13 : vector<4x32xf32>
    %349 = arith.addf %348, %16 : vector<4x32xf32>
    %cst_111 = arith.constant dense<0.000000e+00> : vector<4x64xf32>
    %350 = tpu.matmul %349, %37, %cst_111 {dimension_numbers = #tpu.dot_dimension_numbers<[1], [0], [0], [1], [0, 0, 1, 1], [], []>} : vector<4x32xf32>, vector<32x64xf32>, vector<4x64xf32> -> vector<4x64xf32>
    %351 = arith.addf %350, %29 : vector<4x64xf32>
    %cst_112 = arith.constant 0.000000e+00 : f32
    %352 = vector.broadcast %cst_112 : f32 to vector<4x64xf32>
    %353 = arith.maximumf %351, %352 : vector<4x64xf32>
    %cst_113 = arith.constant dense<0.000000e+00> : vector<4x32xf32>
    %354 = tpu.matmul %353, %39, %cst_113 {dimension_numbers = #tpu.dot_dimension_numbers<[1], [0], [0], [1], [0, 0, 1, 1], [], []>} : vector<4x64xf32>, vector<64x32xf32>, vector<4x32xf32> -> vector<4x32xf32>
    %355 = arith.addf %331, %354 : vector<4x32xf32>
    %356 = arith.addf %355, %32 : vector<4x32xf32>
    %357 = vector.shape_cast %356 : vector<4x32xf32> to vector<1x4x32xf32>
    %c0_114 = arith.constant 0 : index
    %c0_115 = arith.constant 0 : index
    %c0_116 = arith.constant 0 : index
    %358 = vector.load %arg7[%c0_114, %c0_115, %c0_116] : memref<1x4x32xf32, #tpu.memory_space<vmem>>, vector<1x4x32xf32>
    tpu.vector_store %arg7[%c0_114, %c0_115, %c0_116], %357 {strides = array<i32>} : memref<1x4x32xf32, #tpu.memory_space<vmem>>, vector<1x4x32xf32>,
    %cst_117 = arith.constant dense<0.000000e+00> : vector<4x2xf32>
    %359 = tpu.matmul %356, %38, %cst_117 {dimension_numbers = #tpu.dot_dimension_numbers<[1], [0], [0], [1], [0, 0, 1, 1], [], []>} : vector<4x32xf32>, vector<32x2xf32>, vector<4x2xf32> -> vector<4x2xf32>
    %cst_118 = arith.constant 1.000000e+00 : f32
    %360 = vector.broadcast %cst_118 : f32 to vector<4x2xf32>
    %361 = arith.mulf %359, %360 : vector<4x2xf32>
    %c0_119 = arith.constant 0 : index
    %c0_120 = arith.constant 0 : index
    %c0_121 = arith.constant 0 : index
    %362 = vector.load %arg3[%c0_119, %c0_120, %c0_121] : memref<1x4x2xf32, #tpu.memory_space<vmem>>, vector<1x4x2xf32>
    %363 = vector.shape_cast %362 : vector<1x4x2xf32> to vector<4x2xf32>
    %cst_122 = arith.constant 9.99999968E-21 : f32
    %364 = vector.broadcast %cst_122 : f32 to vector<4x2xf32>
    %365 = arith.maximumf %363, %364 : vector<4x2xf32>
    %366 = math.log %365 : vector<4x2xf32>
    %cst_123 = arith.constant 0.000000e+00 : f32
    %367 = vector.broadcast %cst_123 : f32 to vector<4x2xf32>
    %368 = arith.subf %367, %366 : vector<4x2xf32>
    %cst_124 = arith.constant 9.99999968E-21 : f32
    %369 = vector.broadcast %cst_124 : f32 to vector<4x2xf32>
    %370 = arith.maximumf %368, %369 : vector<4x2xf32>
    %371 = math.log %370 : vector<4x2xf32>
    %cst_125 = arith.constant 0.000000e+00 : f32
    %372 = vector.broadcast %cst_125 : f32 to vector<4x2xf32>
    %373 = arith.subf %372, %371 : vector<4x2xf32>
    %374 = arith.addf %361, %373 : vector<4x2xf32>
    %375 = vector.extract_strided_slice %374 {offsets = [0, 1], sizes = [4, 1], strides = [1, 1]} : vector<4x2xf32> to vector<4x1xf32>
    %376 = vector.extract_strided_slice %374 {offsets = [0, 0], sizes = [4, 1], strides = [1, 1]} : vector<4x2xf32> to vector<4x1xf32>
    %377 = arith.cmpf ogt, %375, %376 : vector<4x1xf32>
    %378 = arith.extui %377 : vector<4x1xi1> to vector<4x1xi32>
    %379 = arith.sitofp %378 : vector<4x1xi32> to vector<4x1xf32>
    %380 = vector.extract_strided_slice %361 {offsets = [0, 0], sizes = [4, 1], strides = [1, 1]} : vector<4x2xf32> to vector<4x1xf32>
    %381 = vector.extract_strided_slice %361 {offsets = [0, 1], sizes = [4, 1], strides = [1, 1]} : vector<4x2xf32> to vector<4x1xf32>
    %382 = arith.maximumf %380, %381 : vector<4x1xf32>
    %383 = arith.subf %380, %382 : vector<4x1xf32>
    %384 = math.exp %383 : vector<4x1xf32>
    %385 = arith.subf %381, %382 : vector<4x1xf32>
    %386 = math.exp %385 : vector<4x1xf32>
    %387 = arith.addf %384, %386 : vector<4x1xf32>
    %388 = arith.divf %386, %387 : vector<4x1xf32>
    %389 = arith.addf %379, %388 : vector<4x1xf32>
    %390 = arith.subf %389, %388 : vector<4x1xf32>
    %391 = vector.shape_cast %390 : vector<4x1xf32> to vector<1x4x1xf32>
    %c0_126 = arith.constant 0 : index
    %c0_127 = arith.constant 0 : index
    %c0_128 = arith.constant 0 : index
    %392 = vector.load %arg8[%c0_126, %c0_127, %c0_128] : memref<1x4x1xf32, #tpu.memory_space<vmem>>, vector<1x4x1xf32>
    tpu.vector_store %arg8[%c0_126, %c0_127, %c0_128], %391 {strides = array<i32>} : memref<1x4x1xf32, #tpu.memory_space<vmem>>, vector<1x4x1xf32>,
    return
  }
  func.func @transform_0(%arg0: i32) -> (i32, i32, i32) {
    %c0_i32 = arith.constant 0 : i32
    %c0_i32_0 = arith.constant 0 : i32
    %c0_i32_1 = arith.constant 0 : i32
    return %arg0, %c0_i32, %c0_i32_0 : i32, i32, i32
  }
  func.func @transform_1(%arg0: i32) -> (i32, i32, i32) {
    %c0_i32 = arith.constant 0 : i32
    %c0_i32_0 = arith.constant 0 : i32
    %c0_i32_1 = arith.constant 0 : i32
    return %arg0, %c0_i32, %c0_i32_0 : i32, i32, i32
  }
  func.func @transform_2(%arg0: i32) -> (i32, i32, i32) {
    %c0_i32 = arith.constant 0 : i32
    %c0_i32_0 = arith.constant 0 : i32
    %c0_i32_1 = arith.constant 0 : i32
    return %arg0, %c0_i32, %c0_i32_0 : i32, i32, i32
  }
  func.func @transform_3(%arg0: i32) -> (i32, i32) {
    %c0_i32 = arith.constant 0 : i32
    %c0_i32_0 = arith.constant 0 : i32
    %c0_i32_1 = arith.constant 0 : i32
    return %c0_i32, %c0_i32_0 : i32, i32
  }
  func.func @transform_4(%arg0: i32) -> (i32, i32) {
    %c0_i32 = arith.constant 0 : i32
    %c0_i32_0 = arith.constant 0 : i32
    %c0_i32_1 = arith.constant 0 : i32
    return %c0_i32, %c0_i32_0 : i32, i32
  }
  func.func @transform_5(%arg0: i32) -> (i32, i32) {
    %c0_i32 = arith.constant 0 : i32
    %c0_i32_0 = arith.constant 0 : i32
    %c0_i32_1 = arith.constant 0 : i32
    return %c0_i32, %c0_i32_0 : i32, i32
  }
  func.func @transform_6(%arg0: i32) -> (i32, i32, i32) {
    %c0_i32 = arith.constant 0 : i32
    %c0_i32_0 = arith.constant 0 : i32
    %c0_i32_1 = arith.constant 0 : i32
    return %arg0, %c0_i32, %c0_i32_0 : i32, i32, i32
  }
  func.func @transform_7(%arg0: i32) -> (i32, i32, i32) {
    %c0_i32 = arith.constant 0 : i32
    %c0_i32_0 = arith.constant 0 : i32
    %c0_i32_1 = arith.constant 0 : i32
    return %arg0, %c0_i32, %c0_i32_0 : i32, i32, i32
  }
}

</mosaic_0001>

<bundles_post_ra>
// kernel: tpu_custom_call.1
= control target key start
LH: loop header
LB: loop body
LE: loop exit
PB: predicated region body
PF: predicated region fallthrough
CT: control target
= control target key end

     0   :  { %13 = vsyncpa [#allocation3], 0  ;;  %s2618_s0 = inlined_call_operand.vmem [shape: f32[2,16,32], index: 0, kind: input, shape index: {}]   ;;  %s2619_s1 = inlined_call_operand.vmem [shape: f32[2,4,32], index: 1, kind: input, shape index: {}]   ;;  %s2620_s2 = inlined_call_operand.vmem [shape: f32[2,4,2], index: 2, kind: input, shape index: {}]   ;;  %s2621_s3 = inlined_call_operand.vmem [shape: f32[1,1792], index: 3, kind: input, shape index: {}]   ;;  %s2622_s4 = inlined_call_operand.hbm [shape: f32[32,768], index: 4, kind: input, shape index: {}]   ;;  %s2623_s5 = inlined_call_operand.vmem [shape: f32[64,32], index: 5, kind: input, shape index: {}]   ;;  %s2624_s6 = inlined_call_operand.hbm [shape: f32[2,4,32], index: 6, kind: output, shape index: {0}]   ;;  %s2625_s7 = inlined_call_operand.vmem [shape: f32[2,4,1], index: 7, kind: output, shape index: {1}]  }
   0x1   :  { %14 = vsyncpa [#allocation4], 0 }
   0x2   :  { %16 = vsyncpa [#allocation4 + $0x1], 0  ;;  %s2091_s24 = smov 0   ;;  %s2093_s25 = smov 0  }
   0x3   :  { %s2095_s26 = smov 0   ;;  %s2097_s27 = smov 0  }
   0x4 LB: > { %s2112_s28 = sadd.s32 4294967295, %s2039_s27   ;;  %s1749_s29 = sadd.s32 4294967294, %s2039_s27   ;;  %s2039_s27 = sphi %s2097_s27, %s2631_s27   ;;  %s2035_s26 = sphi %s2095_s26, %s2630_s26   ;;  %s2031_s25 = sphi %s2093_s25, %s2629_s25   ;;  %s2027_s24 = sphi %s2091_s24, %s2628_s24  }
   0x5   : > { %s2116_s30 = sadd.s32 1, %s2039_s27   ;;  %s170_s8 = sadd.s32 1, %s2035_s26 }
   0x6   : > { %s167_s9 = ssub.s32 %s2039_s27, %s2116_s30  ;;  %p180_p0 = scmp.ne.s32.totalorder %s2035_s26, %s2031_s25 }
   0x7   : > { %p168_p1 = scmp.eq.s32.totalorder %s167_s9, 0  ;;  %p181_p2 = scmp.eq.s32.totalorder %s2112_s28, 1 }
   0x8   : > { %p186_p3 = scmp.ne.s32.totalorder %s2031_s25, %s2027_s24  ;;  %p187_p4 = scmp.eq.s32.totalorder %s1749_s29, 1 }
   0x9   : > { %s2127_s10 = scalar_select %p168_p1, %s2035_s26, %s170_s8  }
   0xa   : > { %p2129_p5 = por %p181_p2, %p180_p0  ;;  %p2133_p6 = por %p187_p4, %p186_p3 }
   0xb   : > { %p1750_p7 = scmp.ge.s32.totalorder %s2039_s27, 1  ;;  %p220_p8 = scmp.lt.s32.totalorder %s2039_s27, 3 }
   0xc   : > { %p1814_p9 = scmp.eq.s32.totalorder %s2112_s28, 0  ;;  %s234_s15 = sshll.u32 %s2622_s4, 4  ;;  %s235_s15 = int_to_ptr.hbm [resolvable:$true] %s234_s15 }
   0xd   : > { %p221_p10 = pnand %p1750_p7, %p220_p8  ;;  %s2041_s16 = smov [#allocation2]  }
   0xe   : > { %s236_s17 = sshll.u32 %s2041_s16, 4  ;;  %s2042_s18 = smov 768   ;;  %s237_s17 = int_to_ptr.vmem [resolvable:$true] %s236_s17 }
   0xf   : > { %p1806_p11 = pneg %p221_p10  ;;  %s2043_s19 = smov 48  }
  0x10   : > { %277 = sbr.rel (%p221_p10) target bundleno = 8104 (0x1fa8), region = 44 }
  0x11   : > { %p1807_p12 = pnand %p1814_p9, %p1806_p11 }
  0x13   : > { %1809 = dma.hbm_to_vmem [thread:$0]  (!%p1807_p12), %s235_s15, 3072, %s237_s17, [#allocation3], %s2042_s18, %s2042_s18, %s2043_s19  }
  0x15   : > { %2018 = dma.done.wait (%p1814_p9), [#allocation3], 3072  }
  0x16   : > { %2020 = vsyncadd (%p1814_p9), [#allocation3], 4294964224  ;;  %p322_p13 = scmp.lt.s32.totalorder %s2112_s28, 1  ;;  %vm422_vm0 = vcmask 261120   ;;  %v340_v2 = vld [vmem:[%s2621_s3 + $0x1] sm:$0x1] }
  0x17   : > { %v341_v3 = vmul.f32 1.442695, %v340_v2  ;;  %v1864_v9 = vld [vmem:[%s2621_s3] ss:$0 sm:$0xff]  ;;  %vm516_vm1 = vcmask 257024   ;;  %v2044_v13 = vmov 32.0  }
  0x18   : > { %s323_s20 = scalar_select %p322_p13, %s2112_s28, 1  ;;  %v386_v35 = vld [vmem:[#allocation2 + $0x98] sm:$0xff]  ;;  %v385_v36 = vld [vmem:[#allocation2 + $0x68] sm:$0xff]  ;;  %v2190_v42 = vld [vmem:[#allocation2 + $0x90] sm:$0xff]  ;;  %vm593_vm12 = vcmask 125952  }
  0x19   : > { %1877 = vpow2.f32 %v341_v3  ;;  %505 = vmatpush.msra.mxu0 %v386_v35  ;;  %v384_v37 = vld [vmem:[#allocation2 + $0x38] sm:$0xff]  ;;  %v383_v38 = vld [vmem:[#allocation2 + $0x8] sm:$0xff]  ;;  %556 = vmatpush.msra.mxu1 %v2190_v42  ;;  %v2193_v43 = vld [vmem:[#allocation2 + $0x60] sm:$0xff]  ;;  %s2046_s19 = smov 32   ;;  %s2047_s22 = smov 64  }
  0x1a   : > { %s1799_s21 = sshll.u32 %s323_s20, 4  ;;  %s2158_s13 = sshll.u32 %s323_s20, 2  ;;  %1879 = vrcp.f32 %v2044_v13  ;;  %v2195_v45 = vld [vmem:[#allocation2 + $0x30] sm:$0xff]  ;;  %v2199_v47 = vld [vmem:[#allocation2] sm:$0xff]  ;;  %v2260_v35 = vld [vmem:[%s2621_s3 + $0x8] ss:$0 sm:$0xff] }
  0x1b   : > { %s326_s29 = scalar_lea.vmem %s2618_s0, %s1799_s21  ;;  %s330_s16 = scalar_lea.vmem %s2619_s1, %s2158_s13  ;;  %506 = vmatpush.msra.mxu0 %v385_v36  ;;  %557 = vmatpush.msra.mxu1 %v2193_v43  ;;  %v1865_v60 = vld [vmem:[%s2621_s3 + $0x2] ss:$0 sm:$0xff] }
  0x1c   : > { %v411_v0 = vld [vmem:[%s326_s29] sm:$0xff]  ;;  %v412_v4 = vld [vmem:[%s326_s29 + $0x8] sm:$0xff]  ;;  %s2048_s18 = smov 127   ;;  %s334_s23 = scalar_lea.vmem %s2620_s2, %s2158_s13 }
  0x1d   : > { %v423_v1 = vsel %vm422_vm0, %v411_v0, 0.0  ;;  %v426_v5 = vsel %vm422_vm0, %v412_v4, 0.0  ;;  %v413_v7 = vld [vmem:[%s330_s16] sm:$0xf]  ;;  %507 = vmatpush.msra.mxu0 %v384_v37  ;;  %558 = vmatpush.msra.mxu1 %v2195_v45  ;;  %s2045_s16 = smov 96   ;;  %s1796_s29 = sshll.u32 %s2112_s28, 2 }
  0x1e   : > { %424 = vadd.xlane.f32.xlu0 %v423_v1  ;;  %v2266_v36 = vld [vmem:[#allocation2 + $0x80] sm:$0xff]  ;;  %s1622_s14 = scalar_lea.hbm %s2624_s6, %s1796_s29 }
  0x1f   : > { %v1878_v6 = vpop.eup %1877  ;;  %508 = vmatpush.msra.mxu0 %v383_v38  ;;  %559 = vmatpush.msra.mxu1 %v2199_v47  ;;  %s1626_s20 = sshll.u32 %s1622_s14, 4  ;;  %s1627_s20 = int_to_ptr.hbm [resolvable:$true] %s1626_s20 }
  0x20   : > { %v415_v8 = vperm.slane %v1878_v6, 0  ;;  %v1880_v14 = vpop.eup %1879  ;;  %s1987_s21 = sshra.s32 %s1627_s20, 4  ;;  %s1988_s21 = int_to_ptr.hbm [resolvable:$true] %s1987_s21 }
  0x21   : > { %v430_v15 = vmul.f32 32.0, %v1880_v14  ;;  %vm434_vm2 = vweird.f32 %v1880_v14  ;;  %s1989_s28 = scalar_lea.hbm %s1988_s21, 4  ;;  %p1994_p3 = scmp.lt.s32.totalorder %s1988_s21, %s2624_s6 }
  0x22   : > { %v417_v10 = vmul.f32 %v415_v8, %v413_v7  ;;  %p1990_p0 = scmp.ne.s32.totalorder %s1988_s21, %s1989_s28 }
  0x23   : > { %v431_v16 = vsub.f32 1.0, %v430_v15 }
  0x24   : > { %v2168_v11 = vadd.f32 %v1864_v9, %v417_v10  ;;  %p1991_p1 = pnand %p1990_p0, %p2129_p5 }
  0x25   : > { %v432_v17 = vmul.f32 %v1880_v14, %v431_v16 }
  0x26   : > { %427 = vadd.xlane.f32.xlu0 %v426_v5  ;;  %v517_v12 = vsel %vm516_vm1, %v2168_v11, 0.0  ;;  %p1992_p2 = pneg %p1991_p1 }
  0x27   : > { %518 = vadd.xlane.f32.xlu1 %v517_v12  ;;  %v433_v18 = vadd.f32 %v1880_v14, %v432_v17  ;;  %v2216_v17 = vld [vmem:[%s2621_s3 + $0x4] ss:$0 sm:$0xff] }
  0x29   : > { %v2172_v19 = vsel %vm434_vm2, %v1880_v14, %v433_v18 }
  0x91   : > { %v425_v20 = vpop.xlane.xlu0 %424 }
  0x92   : > { %v436_v21 = vmul.f32 %v2172_v19, %v425_v20  ;;  %v2221_v20 = vld [vmem:[%s2621_s3 + $0x5] ss:$0 sm:$0xff] }
  0x94   : > { %v438_v22 = vsub.f32 %v411_v0, %v436_v21  ;;  %v1866_v0 = vld [vmem:[%s2621_s3 + $0x3] ss:$0 sm:$0xff] }
  0x96   : > { %v440_v23 = vmul.f32 %v438_v22, %v438_v22 }
  0x98   : > { %v442_v24 = vsel %vm422_vm0, %v440_v23, 0.0 }
  0x99   : > { %v428_v25 = vpop.xlane.xlu0 %427  ;;  %443 = vadd.xlane.f32.xlu1 %v442_v24  ;;  %v2227_v24 = vld [vmem:[#allocation2 + $0xa8] sm:$0xff] }
  0x9a   : > { %v437_v26 = vmul.f32 %v2172_v19, %v428_v25  ;;  %v519_v30 = vpop.xlane.xlu1 %518  ;;  %v2229_v25 = vld [vmem:[#allocation2 + $0x78] sm:$0xff]  ;;  %713 = vmatpush.msrb.mxu1 %v2227_v24 }
  0x9b   : > { %v520_v31 = vmul.f32 %v519_v30, %v2172_v19 }
  0x9c   : > { %v2177_v27 = vsub.f32 %v412_v4, %v437_v26  ;;  %714 = vmatpush.msrb.mxu1 %v2229_v25  ;;  %v2233_v26 = vld [vmem:[#allocation2 + $0x48] sm:$0xff] }
  0x9d   : > { %v2184_v32 = vsub.f32 %v2168_v11, %v520_v31 }
  0x9e   : > { %v441_v28 = vmul.f32 %v2177_v27, %v2177_v27  ;;  %715 = vmatpush.msrb.mxu1 %v2233_v26 }
  0x9f   : > { %v522_v33 = vmul.f32 %v2184_v32, %v2184_v32 }
  0xa0   : > { %v445_v29 = vsel %vm422_vm0, %v441_v28, 0.0 }
  0xa1   : > { %446 = vadd.xlane.f32.xlu2 %v445_v29  ;;  %v523_v34 = vsel %vm516_vm1, %v522_v33, 0.0  ;;  %v1869_v29 = vld [vmem:[%s2621_s3 + $0x9] ss:$0 sm:$0xff] }
  0xa9   : > { %524 = vadd.xlane.f32.xlu2 %v523_v34  ;;  %v2255_v34 = vld [vmem:[#allocation2 + $0xb0] sm:$0xff] }
 0x10c   : > { %v444_v39 = vpop.xlane.xlu1 %443 }
 0x10d   : > { %v448_v40 = vmul.f32 %v444_v39, %v2172_v19  ;;  %v2274_v39 = vld [vmem:[#allocation2 + $0x50] sm:$0xff] }
 0x10f   : > { %v450_v41 = vadd.f32 1e-05, %v448_v40  ;;  %v2277_v40 = vld [vmem:[#allocation2 + $0x20] sm:$0xff] }
 0x111   : > { %1881 = vrsqrt.f32 %v450_v41  ;;  %vm458_vm4 = vweird.f32 %v450_v41 }
 0x114   : > { %v447_v44 = vpop.xlane.xlu2 %446 }
 0x115   : > { %v449_v46 = vmul.f32 %v447_v44, %v2172_v19 }
 0x117   : > { %v1882_v48 = vpop.eup %1881  ;;  %v451_v49 = vadd.f32 1e-05, %v449_v46 }
 0x118   : > { %v453_v50 = vmul.f32 %v1882_v48, %v450_v41  ;;  %vm459_vm3 = vweird.f32 %v1882_v48 }
 0x119   : > { %1883 = vrsqrt.f32 %v451_v49  ;;  %vm460_vm5 = vmor %vm458_vm4, %vm459_vm3  ;;  %vm468_vm7 = vweird.f32 %v451_v49 }
 0x11a   : > { %v454_v51 = vmul.f32 %v1882_v48, %v453_v50 }
 0x11c   : > { %v455_v52 = vmul.f32 0.5, %v454_v51  ;;  %v525_v53 = vpop.xlane.xlu2 %524 }
 0x11d   : > { %v526_v55 = vmul.f32 %v525_v53, %v2172_v19 }
 0x11e   : > { %v456_v54 = vsub.f32 1.5, %v455_v52 }
 0x11f   : > { %v1884_v56 = vpop.eup %1883  ;;  %v527_v59 = vadd.f32 1e-05, %v526_v55 }
 0x120   : > { %v457_v57 = vmul.f32 %v1882_v48, %v456_v54  ;;  %v463_v58 = vmul.f32 %v1884_v56, %v451_v49  ;;  %vm469_vm6 = vweird.f32 %v1884_v56 }
 0x121   : > { %1885 = vrsqrt.f32 %v527_v59  ;;  %vm470_vm8 = vmor %vm468_vm7, %vm469_vm6  ;;  %vm534_vm10 = vweird.f32 %v527_v59  ;;  %vm651_vm7 = vcmask 130048  }
 0x122   : > { %v461_v61 = vsel %vm460_vm5, %v1882_v48, %v457_v57  ;;  %v464_v62 = vmul.f32 %v1884_v56, %v463_v58 }
 0x123   : > { %v472_v63 = vmul.f32 %v461_v61, %v438_v22 }
 0x124   : > { %v465_v1 = vmul.f32 0.5, %v464_v62 }
 0x125   : > { %v477_v2 = vmul.f32 %v1865_v60, %v472_v63 }
 0x126   : > { %v466_v3 = vsub.f32 1.5, %v465_v1 }
 0x127   : > { %v482_v4 = vadd.f32 %v1866_v0, %v477_v2  ;;  %v1886_v5 = vpop.eup %1885 }
 0x128   : > { %v467_v6 = vmul.f32 %v1884_v56, %v466_v3  ;;  %v529_v7 = vmul.f32 %v1886_v5, %v527_v59  ;;  %vm535_vm9 = vweird.f32 %v1886_v5 }
 0x129   : > { %1761 = vmatmul.msk.f32.vlgmr.msra.gmra.mxu0 %vm422_vm0, %v482_v4  ;;  %vm536_vm11 = vmor %vm534_vm10, %vm535_vm9 }
 0x12a   : > { %v471_v8 = vsel %vm470_vm8, %v1884_v56, %v467_v6  ;;  %v530_v9 = vmul.f32 %v1886_v5, %v529_v7 }
 0x12b   : > { %v473_v10 = vmul.f32 %v471_v8, %v2177_v27  ;;  %v2236_v27 = vld [vmem:[#allocation2 + $0x18] sm:$0xff] }
 0x12c   : > { %v531_v12 = vmul.f32 0.5, %v530_v9  ;;  %716 = vmatpush.msrb.mxu1 %v2236_v27 }
 0x12d   : > { %v478_v13 = vmul.f32 %v1865_v60, %v473_v10 }
 0x12e   : > { %v532_v14 = vsub.f32 1.5, %v531_v12 }
 0x12f   : > { %v483_v15 = vadd.f32 %v1866_v0, %v478_v13 }
 0x130   : > { %v533_v16 = vmul.f32 %v1886_v5, %v532_v14 }
 0x131   : > { %1762 = vmatmul.msk.f32.gmra.mxu0 %vm422_vm0, %v483_v15 }
 0x132   : > { %v537_v18 = vsel %vm536_vm11, %v1886_v5, %v533_v16  ;;  %v2293_v16 = vld [vmem:[#allocation2 + $0xa0] sm:$0xff] }
 0x133   : > { %v538_v21 = vmul.f32 %v537_v18, %v2184_v32  ;;  %v2295_v18 = vld [vmem:[#allocation2 + $0x70] sm:$0xff] }
 0x135   : > { %v539_v22 = vmul.f32 %v2216_v17, %v538_v21  ;;  %v2298_v21 = vld [vmem:[#allocation2 + $0x40] sm:$0xff] }
 0x137   : > { %v540_v23 = vadd.f32 %v2221_v20, %v539_v22  ;;  %v2301_v22 = vld [vmem:[#allocation2 + $0x10] sm:$0xff] }
 0x139   : > { %1763 = vmatmul.msk.f32.vlgmr.msra.gmra.mxu1 %vm422_vm0, %v540_v23 }
 0x141   : > { %1769 = vmatmul.msk.f32.vlgmr.msrb.gmra.mxu1 %vm422_vm0, %v2168_v11 }
 0x1a6   : > { %v510_v28 = vpop.f32.mrf.mxu0 }
 0x1a7   : > { %v2244_v31 = vadd.f32 %v1869_v29, %v510_v28 }
 0x1ae   : > { %v513_v30 = vpop.f32.mrf.mxu0 }
 0x1af   : > { %v2246_v32 = vadd.f32 %v1869_v29, %v513_v30 }
 0x1b1   : > { %1764 = vmatpush.xpose.msk.msra.mxu2 %vm422_vm0, %v2246_v32  ;;  %1774 = vmatpush.xpose.msk.msra.mxu1 %vm422_vm0, %v2246_v32  ;;  %v1859_v33 = vpack.i.bf16 %v2244_v31, %v2246_v32 }
 0x1b3   : > { %1860 = vrot.lane.b32.xlu1 %v1859_v33, %s2045_s16 }
 0x1b5   : > { %1765 = vmatpush.xpose.msk.msra.mxu2 %vm422_vm0, %v2244_v31  ;;  %1775 = vmatpush.xpose.msk.msra.mxu1 %vm422_vm0, %v2244_v31 }
 0x1b6   : > { %v561_v37 = vpop.f32.mrf.mxu1 }
 0x1b7   : > { %v562_v38 = vadd.f32 %v2260_v35, %v561_v37 }
 0x1b9   : > { %818 = vmatpush.msrb.mxu2 %v2255_v34  ;;  %1153 = vmatpush.msrb.mxu1 %v2255_v34 }
 0x1ba   : > { %1766 = vmatmul.msk.f32.vlgmr.msra.gmra.mxu2 %vm422_vm0, %v562_v38 }
 0x1bb   : > { %819 = vmatpush.msrb.mxu2 %v2266_v36  ;;  %1154 = vmatpush.msrb.mxu1 %v2266_v36 }
 0x1bc   : > { %758 = vrot.lane.b32.xlu1 %v2168_v11, %s2046_s19  ;;  %v2327_v11 = vld [vmem:[%s2621_s3 + $0xa] ss:$0 sm:$0xff] }
 0x1bd   : > { %820 = vmatpush.msrb.mxu2 %v2274_v39  ;;  %1155 = vmatpush.msrb.mxu1 %v2274_v39 }
 0x1bf   : > { %821 = vmatpush.msrb.mxu2 %v2277_v40  ;;  %1156 = vmatpush.msrb.mxu1 %v2277_v40 }
 0x225   : > { %v1861_v41 = vpop.permute.xlu1 %1860 }
 0x226   : > { %v2282_v44 = vunpack.i.l.bf16 %v1861_v41  ;;  %v2284_v46 = vunpack.i.h.bf16 %v1861_v41 }
 0x228   : > { %669 = vmatpush.msra.mxu3 %v2282_v44  ;;  %1014 = vmatpush.msra.mxu2 %v2282_v44 }
 0x22a   : > { %670 = vmatpush.msra.mxu3 %v2284_v46  ;;  %1015 = vmatpush.msra.mxu2 %v2284_v46 }
 0x22c   : > { %690 = vmatpush.msrb.mxu3 %v2293_v16 }
 0x22e   : > { %691 = vmatpush.msrb.mxu3 %v2295_v18 }
 0x230   : > { %692 = vmatpush.msrb.mxu3 %v2298_v21 }
 0x232   : > { %693 = vmatpush.msrb.mxu3 %v2301_v22 }
 0x23d   : > { %v590_v48 = vpop.f32.mrf.mxu2 }
 0x23e   : > { %v594_v49 = vsel %vm593_vm12, %v590_v48, -inf }
 0x23f   : > { %v595_v50 = vrot.slane %v594_v49, 4 }
 0x241   : > { %v596_v51 = vmax.f32 %v594_v49, %v595_v50 }
 0x243   : > { %v597_v52 = vrot.slane %v596_v51, 2 }
 0x245   : > { %v598_v53 = vmax.f32 %v596_v51, %v597_v52  ;;  %v2315_v52 = vld [vmem:[%s2621_s3 + $0xb] ss:$0 sm:$0xff] }
 0x247   : > { %v599_v54 = vrot.slane %v598_v53, 1 }
 0x249   : > { %v600_v55 = vmax.f32 %v598_v53, %v599_v54  ;;  %v718_v53 = vpop.f32.mrf.mxu1 }
 0x24a   : > { %v719_v54 = vadd.f32 %v2315_v52, %v718_v53 }
 0x24b   : > { %v601_v56 = vsub.f32 %v590_v48, %v600_v55 }
 0x24c   : > { %742 = vrot.lane.b32.xlu2 %v719_v54, %s2047_s22 }
 0x24d   : > { %v602_v57 = vmul.f32 1.442695, %v601_v56 }
 0x24f   : > { %1887 = vpow2.f32 %v602_v57 }
 0x255   : > { %v1888_v58 = vpop.eup %1887 }
 0x256   : > { %v604_v59 = vsel %vm593_vm12, %v1888_v58, 0.0 }
 0x257   : > { %v605_v60 = vrot.slane %v604_v59, 4 }
 0x259   : > { %v606_v61 = vadd.f32 %v605_v60, %v604_v59 }
 0x25b   : > { %v607_v62 = vrot.slane %v606_v61, 2 }
 0x25d   : > { %v608_v63 = vadd.f32 %v607_v62, %v606_v61 }
 0x25f   : > { %v609_v0 = vrot.slane %v608_v63, 1 }
 0x261   : > { %v610_v1 = vadd.f32 %v609_v0, %v608_v63 }
 0x263   : > { %1889 = vrcp.f32 %v610_v1  ;;  %v622_v5 = vand.u32 2147483648, %v610_v1  ;;  %v620_v7 = vand.u32 2147483647, %v610_v1  ;;  %vm616_vm14 = vweird.f32 %v610_v1 }
 0x265   : > { %v623_v9 = vor.u32 1.1754944e-38, %v622_v5  ;;  %vm621_vm2 = vcmp.eq.f32.partialorder %v620_v7, 8.507059e+37 }
 0x269   : > { %v1890_v2 = vpop.eup %1889 }
 0x26a   : > { %v612_v3 = vmul.f32 %v1890_v2, %v610_v1  ;;  %vm617_vm13 = vweird.f32 %v1890_v2 }
 0x26b   : > { %vm618_vm15 = vmor %vm616_vm14, %vm617_vm13 }
 0x26c   : > { %v613_v4 = vsub.f32 1.0, %v612_v3 }
 0x26e   : > { %v614_v6 = vmul.f32 %v1890_v2, %v613_v4 }
 0x270   : > { %v615_v8 = vadd.f32 %v1890_v2, %v614_v6 }
 0x272   : > { %v619_v10 = vsel %vm618_vm15, %v1890_v2, %v615_v8 }
 0x273   : > { %v624_v12 = vsel %vm621_vm2, %v623_v9, %v619_v10  ;;  %vm827_vm2 = vcmask 523264  }
 0x274   : > { %v625_v13 = vmul.f32 %v1888_v58, %v624_v12 }
 0x276   : > { %v626_v14 = vadd.f32 1e-08, %v625_v13 }
 0x278   : > { %v627_v15 = vsel %vm593_vm12, %v626_v14, 0.0 }
 0x279   : > { %628 = vadd.xlane.f32.xlu0 %v627_v15 }
 0x2a6   : > { %v743_v5 = vpop.permute.xlu2 %742 }
 0x2ec   : > { %v629_v23 = vpop.xlane.xlu0 %628 }
 0x2ed   : > { %1891 = vrcp.f32 %v629_v23  ;;  %v641_v33 = vand.u32 2147483648, %v629_v23  ;;  %v639_v38 = vand.u32 2147483647, %v629_v23  ;;  %vm635_vm4 = vweird.f32 %v629_v23 }
 0x2ef   : > { %v642_v48 = vor.u32 1.1754944e-38, %v641_v33  ;;  %vm640_vm6 = vcmp.eq.f32.partialorder %v639_v38, 8.507059e+37 }
 0x2f3   : > { %v1892_v28 = vpop.eup %1891 }
 0x2f4   : > { %v631_v29 = vmul.f32 %v1892_v28, %v629_v23  ;;  %vm636_vm3 = vweird.f32 %v1892_v28 }
 0x2f5   : > { %vm637_vm5 = vmor %vm635_vm4, %vm636_vm3 }
 0x2f6   : > { %v632_v30 = vsub.f32 1.0, %v631_v29 }
 0x2f8   : > { %v633_v37 = vmul.f32 %v1892_v28, %v632_v30 }
 0x2fa   : > { %v634_v41 = vadd.f32 %v1892_v28, %v633_v37 }
 0x2fc   : > { %v638_v49 = vsel %vm637_vm5, %v1892_v28, %v634_v41 }
 0x2fd   : > { %v643_v50 = vsel %vm640_vm6, %v642_v48, %v638_v49 }
 0x2fe   : > { %v644_v51 = vmul.f32 %v643_v50, %v626_v14  ;;  %v759_v14 = vpop.permute.xlu1 %758  ;;  %v1873_v50 = vld [vmem:[%s2621_s3 + $0x6] ss:$0 sm:$0xff] }
 0x300   : > { %1767 = vmatmul.msk.f32.vlgmr.msra.gmra.mxu3 %vm651_vm7, %v644_v51  ;;  %v1874_v51 = vld [vmem:[%s2621_s3 + $0x7] ss:$0 sm:$0xff] }
 0x301   : > { %915 = vmatpush.msra.mxu3 %v2190_v42 }
 0x303   : > { %916 = vmatpush.msra.mxu3 %v2193_v43 }
 0x305   : > { %917 = vmatpush.msra.mxu3 %v2195_v45 }
 0x307   : > { %918 = vmatpush.msra.mxu3 %v2199_v47 }
 0x383   : > { %v672_v55 = vpop.f32.mrf.mxu3 }
 0x384   : > { %1768 = vmatmul.msk.f32.vlgmr.msrb.gmra.mxu3 %vm422_vm0, %v672_v55 }
 0x385   : > { %1035 = vmatpush.msrb.mxu3 %v2293_v16 }
 0x387   : > { %1036 = vmatpush.msrb.mxu3 %v2295_v18 }
 0x389   : > { %1037 = vmatpush.msrb.mxu3 %v2298_v21 }
 0x38b   : > { %1038 = vmatpush.msrb.mxu3 %v2301_v22 }
 0x407   : > { %v695_v56 = vpop.f32.mrf.mxu3 }
 0x408   : > { %v696_v57 = vadd.f32 %v2327_v11, %v695_v56 }
 0x40a   : > { %v721_v58 = vadd.f32 %v719_v54, %v696_v57 }
 0x40c   : > { %v1770_v59 = vmul.f32 -1.442695, %v721_v58 }
 0x40e   : > { %1893 = vpow2.f32 %v1770_v59 }
 0x414   : > { %v1894_v60 = vpop.eup %1893 }
 0x415   : > { %v725_v61 = vadd.f32 1.0, %v1894_v60 }
 0x417   : > { %1895 = vrcp.f32 %v725_v61  ;;  %v737_v1 = vand.u32 2147483648, %v725_v61  ;;  %v735_v3 = vand.u32 2147483647, %v725_v61  ;;  %vm731_vm9 = vweird.f32 %v725_v61 }
 0x419   : > { %v738_v6 = vor.u32 1.1754944e-38, %v737_v1  ;;  %vm736_vm11 = vcmp.eq.f32.partialorder %v735_v3, 8.507059e+37 }
 0x41d   : > { %v1896_v62 = vpop.eup %1895 }
 0x41e   : > { %v727_v63 = vmul.f32 %v1896_v62, %v725_v61  ;;  %vm732_vm8 = vweird.f32 %v1896_v62 }
 0x41f   : > { %vm733_vm10 = vmor %vm731_vm9, %vm732_vm8 }
 0x420   : > { %v728_v0 = vsub.f32 1.0, %v727_v63 }
 0x422   : > { %v729_v2 = vmul.f32 %v1896_v62, %v728_v0 }
 0x424   : > { %v730_v4 = vadd.f32 %v1896_v62, %v729_v2 }
 0x426   : > { %v734_v7 = vsel %vm733_vm10, %v1896_v62, %v730_v4 }
 0x427   : > { %v739_v8 = vsel %vm736_vm11, %v738_v6, %v734_v7  ;;  %v2360_v6 = vld [vmem:[%s2623_s5 + $0x38] sm:$0xff]  ;;  %v2365_v7 = vld [vmem:[%s2623_s5 + $0x30] sm:$0xff] }
 0x428   : > { %v745_v9 = vmul.f32 %v743_v5, %v739_v8  ;;  %v752_v15 = vsub.f32 1.0, %v739_v8  ;;  %v761_v28 = vmul.f32 %v759_v14, %v739_v8  ;;  %839 = vmatpush.msrb.mxu0 %v2360_v6  ;;  %v2371_v8 = vld [vmem:[%s2623_s5 + $0x28] sm:$0xff]  ;;  %v2401_v14 = vld [vmem:[%s2623_s5] sm:$0xff] }
 0x42a   : > { %747 = vrot.lane.b32.xlu0 %v745_v9, %s2047_s22  ;;  %840 = vmatpush.msrb.mxu0 %v2365_v7  ;;  %v2377_v9 = vld [vmem:[%s2623_s5 + $0x20] sm:$0xff] }
 0x42c   : > { %841 = vmatpush.msrb.mxu0 %v2371_v8 }
 0x42e   : > { %842 = vmatpush.msrb.mxu0 %v2377_v9 }
 0x49c   : > { %v748_v10 = vpop.permute.xlu0 %747 }
 0x49d   : > { %v750_v12 = vadd.f32 %v748_v10, %v696_v57  ;;  %v2383_v10 = vld [vmem:[%s2623_s5 + $0x18] sm:$0xff] }
 0x49e   : > { %843 = vmatpush.msrb.mxu0 %v2383_v10 }
 0x49f   : > { %1897 = vtanh.f32 %v750_v12  ;;  %v2389_v12 = vld [vmem:[%s2623_s5 + $0x10] sm:$0xff] }
 0x4a0   : > { %844 = vmatpush.msrb.mxu0 %v2389_v12 }
 0x4a5   : > { %v1898_v13 = vpop.eup %1897 }
 0x4a6   : > { %754 = vrot.lane.b32.xlu2 %v1898_v13, %s2045_s16  ;;  %v2395_v13 = vld [vmem:[%s2623_s5 + $0x8] sm:$0xff] }
 0x4a7   : > { %845 = vmatpush.msrb.mxu0 %v2395_v13 }
 0x4a9   : > { %846 = vmatpush.msrb.mxu0 %v2401_v14 }
 0x4ab   : > { %1057 = vmatpush.msra.mxu0 %v2227_v24 }
 0x4ad   : > { %1058 = vmatpush.msra.mxu0 %v2229_v25 }
 0x4af   : > { %1059 = vmatpush.msra.mxu0 %v2233_v26 }
 0x4b1   : > { %1060 = vmatpush.msra.mxu0 %v2236_v27 }
 0x500   : > { %v755_v23 = vpop.permute.xlu2 %754 }
 0x501   : > { %v757_v29 = vmul.f32 %v755_v23, %v752_v15  ;;  %v2421_v23 = vld [vmem:[%s2621_s3 + $0xc] ss:$0 sm:$0xff] }
 0x503   : > { %v2332_v30 = vadd.f32 %v761_v28, %v757_v29 }
 0x505   : > { %764 = vrot.lane.b32.xlu0 %v2332_v30, %s2045_s16 }
 0x577   : > { %v765_v33 = vpop.permute.xlu0 %764 }
 0x578   : > { %v767_v37 = vsel %vm516_vm1, %v765_v33, 0.0 }
 0x579   : > { %768 = vadd.xlane.f32.xlu2 %v767_v37 }
 0x5ec   : > { %v769_v38 = vpop.xlane.xlu2 %768 }
 0x5ed   : > { %v770_v41 = vmul.f32 %v769_v38, %v2172_v19  ;;  %v1876_v38 = vld [vmem:[%s2621_s3 + $0xd] ss:$0 sm:$0xff] }
 0x5ef   : > { %v771_v48 = vsub.f32 %v2332_v30, %v770_v41 }
 0x5f1   : > { %v772_v49 = vmul.f32 %v771_v48, %v771_v48 }
 0x5f3   : > { %774 = vrot.lane.b32.xlu1 %v772_v49, %s2045_s16 }
 0x5fb   : > { %793 = vrot.lane.b32.xlu1 %v1873_v50, %s2046_s19 }
 0x603   : > { %797 = vrot.lane.b32.xlu1 %v1874_v51, %s2046_s19 }
 0x665   : > { %v775_v53 = vpop.permute.xlu1 %774 }
 0x666   : > { %v777_v54 = vsel %vm516_vm1, %v775_v53, 0.0 }
 0x667   : > { %778 = vadd.xlane.f32.xlu0 %v777_v54 }
 0x66d   : > { %v2350_v61 = vpop.permute.xlu1 %793 }
 0x675   : > { %v2352_v3 = vpop.permute.xlu1 %797 }
 0x6da   : > { %v779_v55 = vpop.xlane.xlu0 %778 }
 0x6db   : > { %v780_v56 = vmul.f32 %v779_v55, %v2172_v19 }
 0x6dd   : > { %v781_v57 = vadd.f32 1e-05, %v780_v56 }
 0x6df   : > { %1899 = vrsqrt.f32 %v781_v57  ;;  %vm788_vm14 = vweird.f32 %v781_v57 }
 0x6e5   : > { %v1900_v58 = vpop.eup %1899 }
 0x6e6   : > { %v783_v59 = vmul.f32 %v1900_v58, %v781_v57  ;;  %vm789_vm13 = vweird.f32 %v1900_v58 }
 0x6e7   : > { %vm790_vm15 = vmor %vm788_vm14, %vm789_vm13 }
 0x6e8   : > { %v784_v60 = vmul.f32 %v1900_v58, %v783_v59 }
 0x6ea   : > { %v785_v62 = vmul.f32 0.5, %v784_v60 }
 0x6ec   : > { %v786_v63 = vsub.f32 1.5, %v785_v62 }
 0x6ee   : > { %v787_v0 = vmul.f32 %v1900_v58, %v786_v63 }
 0x6f0   : > { %v791_v1 = vsel %vm790_vm15, %v1900_v58, %v787_v0 }
 0x6f1   : > { %v792_v2 = vmul.f32 %v791_v1, %v771_v48 }
 0x6f3   : > { %v796_v4 = vmul.f32 %v2350_v61, %v792_v2 }
 0x6f5   : > { %v800_v5 = vadd.f32 %v2352_v3, %v796_v4 }
 0x6f7   : > { %802 = vrot.lane.b32.xlu1 %v800_v5, %s2045_s16 }
 0x769   : > { %v803_v15 = vpop.permute.xlu1 %802 }
 0x76a   : > { %1771 = vmatmul.msk.f32.vlgmr.msrb.gmra.mxu2 %vm422_vm0, %v803_v15 }
 0x76b   : > { %1173 = vmatpush.msrb.mxu2 %v2360_v6 }
 0x76d   : > { %1174 = vmatpush.msrb.mxu2 %v2365_v7 }
 0x76f   : > { %1175 = vmatpush.msrb.mxu2 %v2371_v8 }
 0x771   : > { %1176 = vmatpush.msrb.mxu2 %v2377_v9 }
 0x773   : > { %1177 = vmatpush.msrb.mxu2 %v2383_v10 }
 0x775   : > { %1178 = vmatpush.msrb.mxu2 %v2389_v12 }
 0x777   : > { %1179 = vmatpush.msrb.mxu2 %v2395_v13 }
 0x779   : > { %1180 = vmatpush.msrb.mxu2 %v2401_v14 }
 0x7ed   : > { %v823_v28 = vpop.f32.mrf.mxu2 }
 0x7ee   : > { %v824_v29 = vadd.f32 %v2421_v23, %v823_v28 }
 0x7f0   : > { %v826_v33 = vmax.f32 %v824_v29, 0.0 }
 0x7f2   : > { %1772 = vmatmul.msk.f32.vlgmr.msrb.gmra.mxu0 %vm827_vm2, %v826_v33 }
 0x7f3   : > { %1784 = vmatpush.xpose.msk.msrb.mxu0 %vm422_vm0, %v2246_v32 }
 0x7f7   : > { %1785 = vmatpush.xpose.msk.msrb.mxu0 %vm422_vm0, %v2244_v31 }
 0x86f   : > { %v848_v37 = vpop.f32.mrf.mxu0 }
 0x870   : > { %852 = vrot.lane.b32.xlu1 %v848_v37, %s2046_s19 }
 0x878   : > { %856 = vrot.lane.b32.xlu1 %v1876_v38, %s2046_s19 }
 0x8e2   : > { %v853_v41 = vpop.permute.xlu1 %852 }
 0x8e3   : > { %v855_v48 = vadd.f32 %v853_v41, %v2332_v30 }
 0x8ea   : > { %v2435_v49 = vpop.permute.xlu1 %856 }
 0x8eb   : > { %v2438_v50 = vadd.f32 %v2435_v49, %v855_v48 }
 0x8ed   : > { %861 = vrot.lane.b32.xlu2 %v2438_v50, %s2045_s16 }
 0x947   : > { %v862_v31 = vpop.permute.xlu2 %861 }
 0x948   : > { %1779 = vmatmul.msk.f32.vlgmr.msra.gmra.mxu0 %vm422_vm0, %v862_v31  ;;  %v864_v32 = vsel %vm516_vm1, %v862_v31, 0.0 }
 0x949   : > { %865 = vadd.xlane.f32.xlu0 %v864_v32  ;;  %1382 = vmatpush.msra.mxu0 %v2227_v24 }
 0x94b   : > { %1383 = vmatpush.msra.mxu0 %v2229_v25 }
 0x94d   : > { %1384 = vmatpush.msra.mxu0 %v2233_v26 }
 0x94f   : > { %1385 = vmatpush.msra.mxu0 %v2236_v27 }
 0x9bc   : > { %v866_v30 = vpop.xlane.xlu0 %865 }
 0x9bd   : > { %v867_v51 = vmul.f32 %v866_v30, %v2172_v19 }
 0x9bf   : > { %v868_v53 = vsub.f32 %v2438_v50, %v867_v51 }
 0x9c1   : > { %v869_v54 = vmul.f32 %v868_v53, %v868_v53 }
 0x9c3   : > { %871 = vrot.lane.b32.xlu1 %v869_v54, %s2045_s16 }
 0x9c5   : > { %v1062_v4 = vpop.f32.mrf.mxu0 }
 0x9c6   : > { %v2465_v5 = vadd.f32 %v2315_v52, %v1062_v4 }
 0x9cb   : > { %890 = vrot.lane.b32.xlu1 %v2216_v17, %s2046_s19 }
 0xa35   : > { %v872_v55 = vpop.permute.xlu1 %871 }
 0xa36   : > { %v874_v24 = vsel %vm516_vm1, %v872_v55, 0.0 }
 0xa37   : > { %875 = vadd.xlane.f32.xlu0 %v874_v24 }
 0xa3d   : > { %v2457_v63 = vpop.permute.xlu1 %890 }
 0xa4b   : > { %894 = vrot.lane.b32.xlu0 %v2221_v20, %s2046_s19 }
 0xaaa   : > { %v876_v25 = vpop.xlane.xlu0 %875 }
 0xaab   : > { %v877_v26 = vmul.f32 %v876_v25, %v2172_v19 }
 0xaad   : > { %v878_v27 = vadd.f32 1e-05, %v877_v26 }
 0xaaf   : > { %1901 = vrsqrt.f32 %v878_v27  ;;  %vm885_vm4 = vweird.f32 %v878_v27 }
 0xab5   : > { %v1902_v56 = vpop.eup %1901 }
 0xab6   : > { %v880_v57 = vmul.f32 %v1902_v56, %v878_v27  ;;  %vm886_vm3 = vweird.f32 %v1902_v56 }
 0xab7   : > { %vm887_vm5 = vmor %vm885_vm4, %vm886_vm3 }
 0xab8   : > { %v881_v58 = vmul.f32 %v1902_v56, %v880_v57 }
 0xaba   : > { %v882_v59 = vmul.f32 0.5, %v881_v58 }
 0xabc   : > { %v883_v60 = vsub.f32 1.5, %v882_v59 }
 0xabd   : > { %v2459_v1 = vpop.permute.xlu0 %894 }
 0xabe   : > { %v884_v17 = vmul.f32 %v1902_v56, %v883_v60 }
 0xac0   : > { %v888_v62 = vsel %vm887_vm5, %v1902_v56, %v884_v17 }
 0xac1   : > { %v889_v0 = vmul.f32 %v888_v62, %v868_v53 }
 0xac3   : > { %v893_v20 = vmul.f32 %v2457_v63, %v889_v0 }
 0xac5   : > { %v897_v2 = vadd.f32 %v2459_v1, %v893_v20 }
 0xac7   : > { %899 = vrot.lane.b32.xlu1 %v897_v2, %s2045_s16 }
 0xacf   : > { %1086 = vrot.lane.b32.xlu1 %v2465_v5, %s2047_s22 }
 0xb39   : > { %v900_v15 = vpop.permute.xlu1 %899 }
 0xb3a   : > { %1773 = vmatmul.msk.f32.vlgmr.msra.gmra.mxu3 %vm422_vm0, %v900_v15 }
 0xb3b   : > { %1240 = vmatpush.msra.mxu3 %v2190_v42 }
 0xb3d   : > { %1241 = vmatpush.msra.mxu3 %v2193_v43 }
 0xb3f   : > { %1242 = vmatpush.msra.mxu3 %v2195_v45 }
 0xb41   : > { %1243 = vmatpush.msra.mxu3 %v2199_v47 }
 0xbbd   : > { %v920_v28 = vpop.f32.mrf.mxu3 }
 0xbbe   : > { %v921_v29 = vadd.f32 %v2260_v35, %v920_v28 }
 0xbc0   : > { %1776 = vmatmul.msk.f32.vlgmr.msra.gmra.mxu1 %vm422_vm0, %v921_v29 }
 0xbc1   : > { %1339 = vmatpush.msra.mxu1 %v2282_v44 }
 0xbc3   : > { %1340 = vmatpush.msra.mxu1 %v2284_v46 }
 0xc3d   : > { %v943_v33 = vpop.f32.mrf.mxu1 }
 0xc3e   : > { %v946_v37 = vsel %vm593_vm12, %v943_v33, -inf }
 0xc3f   : > { %v947_v38 = vrot.slane %v946_v37, 4 }
 0xc41   : > { %v948_v42 = vmax.f32 %v946_v37, %v947_v38 }
 0xc43   : > { %v949_v41 = vrot.slane %v948_v42, 2 }
 0xc45   : > { %v950_v43 = vmax.f32 %v948_v42, %v949_v41 }
 0xc47   : > { %v951_v48 = vrot.slane %v950_v43, 1 }
 0xc49   : > { %v952_v45 = vmax.f32 %v950_v43, %v951_v48 }
 0xc4b   : > { %v953_v31 = vsub.f32 %v943_v33, %v952_v45 }
 0xc4d   : > { %v954_v47 = vmul.f32 1.442695, %v953_v31 }
 0xc4f   : > { %1903 = vpow2.f32 %v954_v47 }
 0xc55   : > { %v1904_v32 = vpop.eup %1903 }
 0xc56   : > { %v956_v30 = vsel %vm593_vm12, %v1904_v32, 0.0 }
 0xc57   : > { %v957_v51 = vrot.slane %v956_v30, 4 }
 0xc59   : > { %v958_v53 = vadd.f32 %v957_v51, %v956_v30  ;;  %v1087_v30 = vpop.permute.xlu1 %1086 }
 0xc5b   : > { %v959_v44 = vrot.slane %v958_v53, 2 }
 0xc5d   : > { %v960_v54 = vadd.f32 %v959_v44, %v958_v53 }
 0xc5f   : > { %v961_v46 = vrot.slane %v960_v54, 1 }
 0xc61   : > { %v962_v55 = vadd.f32 %v961_v46, %v960_v54 }
 0xc63   : > { %1905 = vrcp.f32 %v962_v55  ;;  %v974_v27 = vand.u32 2147483648, %v962_v55  ;;  %v972_v57 = vand.u32 2147483647, %v962_v55  ;;  %vm968_vm8 = vweird.f32 %v962_v55 }
 0xc65   : > { %v975_v59 = vor.u32 1.1754944e-38, %v974_v27  ;;  %vm973_vm10 = vcmp.eq.f32.partialorder %v972_v57, 8.507059e+37 }
 0xc69   : > { %v1906_v24 = vpop.eup %1905 }
 0xc6a   : > { %v964_v25 = vmul.f32 %v1906_v24, %v962_v55  ;;  %vm969_vm6 = vweird.f32 %v1906_v24 }
 0xc6b   : > { %vm970_vm9 = vmor %vm968_vm8, %vm969_vm6 }
 0xc6c   : > { %v965_v26 = vsub.f32 1.0, %v964_v25 }
 0xc6e   : > { %v966_v56 = vmul.f32 %v1906_v24, %v965_v26 }
 0xc70   : > { %v967_v58 = vadd.f32 %v1906_v24, %v966_v56 }
 0xc72   : > { %v971_v60 = vsel %vm970_vm9, %v1906_v24, %v967_v58 }
 0xc73   : > { %v976_v17 = vsel %vm973_vm10, %v975_v59, %v971_v60 }
 0xc74   : > { %v977_v62 = vmul.f32 %v1904_v32, %v976_v17 }
 0xc76   : > { %v978_v0 = vadd.f32 1e-08, %v977_v62 }
 0xc78   : > { %v979_v20 = vsel %vm593_vm12, %v978_v0, 0.0 }
 0xc79   : > { %980 = vadd.xlane.f32.xlu2 %v979_v20 }
 0xcec   : > { %v981_v2 = vpop.xlane.xlu2 %980 }
 0xced   : > { %1907 = vrcp.f32 %v981_v2  ;;  %v993_v29 = vand.u32 2147483648, %v981_v2  ;;  %v991_v37 = vand.u32 2147483647, %v981_v2  ;;  %vm987_vm13 = vweird.f32 %v981_v2 }
 0xcef   : > { %v994_v42 = vor.u32 1.1754944e-38, %v993_v29  ;;  %vm992_vm15 = vcmp.eq.f32.partialorder %v991_v37, 8.507059e+37 }
 0xcf3   : > { %v1908_v4 = vpop.eup %1907 }
 0xcf4   : > { %v983_v15 = vmul.f32 %v1908_v4, %v981_v2  ;;  %vm988_vm11 = vweird.f32 %v1908_v4 }
 0xcf5   : > { %vm989_vm14 = vmor %vm987_vm13, %vm988_vm11 }
 0xcf6   : > { %v984_v28 = vsub.f32 1.0, %v983_v15 }
 0xcf8   : > { %v985_v33 = vmul.f32 %v1908_v4, %v984_v28 }
 0xcfa   : > { %v986_v38 = vadd.f32 %v1908_v4, %v985_v33 }
 0xcfc   : > { %v990_v41 = vsel %vm989_vm14, %v1908_v4, %v986_v38 }
 0xcfd   : > { %v995_v43 = vsel %vm992_vm15, %v994_v42, %v990_v41 }
 0xcfe   : > { %v996_v48 = vmul.f32 %v995_v43, %v978_v0 }
 0xd00   : > { %1777 = vmatmul.msk.f32.vlgmr.msra.gmra.mxu2 %vm651_vm7, %v996_v48 }
 0xd01   : > { %1498 = vmatpush.msra.mxu2 %v2360_v6 }
 0xd03   : > { %1499 = vmatpush.msra.mxu2 %v2365_v7 }
 0xd05   : > { %1500 = vmatpush.msra.mxu2 %v2371_v8 }
 0xd07   : > { %1501 = vmatpush.msra.mxu2 %v2377_v9 }
 0xd09   : > { %1502 = vmatpush.msra.mxu2 %v2383_v10 }
 0xd0b   : > { %1503 = vmatpush.msra.mxu2 %v2389_v12 }
 0xd0d   : > { %1504 = vmatpush.msra.mxu2 %v2395_v13 }
 0xd0f   : > { %1505 = vmatpush.msra.mxu2 %v2401_v14 }
 0xd83   : > { %v1017_v45 = vpop.f32.mrf.mxu2 }
 0xd84   : > { %1778 = vmatmul.msk.f32.vlgmr.msrb.gmra.mxu3 %vm422_vm0, %v1017_v45 }
 0xd85   : > { %1360 = vmatpush.msrb.mxu3 %v2293_v16 }
 0xd87   : > { %1361 = vmatpush.msrb.mxu3 %v2295_v18 }
 0xd89   : > { %1362 = vmatpush.msrb.mxu3 %v2298_v21 }
 0xd8b   : > { %1363 = vmatpush.msrb.mxu3 %v2301_v22 }
 0xe07   : > { %v1040_v6 = vpop.f32.mrf.mxu3 }
 0xe08   : > { %v1041_v7 = vadd.f32 %v2327_v11, %v1040_v6 }
 0xe0a   : > { %v1065_v8 = vadd.f32 %v2465_v5, %v1041_v7 }
 0xe0c   : > { %v1780_v9 = vmul.f32 -1.442695, %v1065_v8 }
 0xe0e   : > { %1909 = vpow2.f32 %v1780_v9 }
 0xe14   : > { %v1910_v10 = vpop.eup %1909 }
 0xe15   : > { %v1069_v12 = vadd.f32 1.0, %v1910_v10 }
 0xe17   : > { %1911 = vrcp.f32 %v1069_v12  ;;  %v1081_v16 = vand.u32 2147483648, %v1069_v12  ;;  %v1079_v18 = vand.u32 2147483647, %v1069_v12  ;;  %vm1075_vm4 = vweird.f32 %v1069_v12 }
 0xe19   : > { %v1082_v22 = vor.u32 1.1754944e-38, %v1081_v16  ;;  %vm1080_vm6 = vcmp.eq.f32.partialorder %v1079_v18, 8.507059e+37 }
 0xe1d   : > { %v1912_v13 = vpop.eup %1911 }
 0xe1e   : > { %v1071_v14 = vmul.f32 %v1912_v13, %v1069_v12  ;;  %vm1076_vm3 = vweird.f32 %v1912_v13 }
 0xe1f   : > { %vm1077_vm5 = vmor %vm1075_vm4, %vm1076_vm3 }
 0xe20   : > { %v1072_v31 = vsub.f32 1.0, %v1071_v14 }
 0xe22   : > { %v1073_v47 = vmul.f32 %v1912_v13, %v1072_v31 }
 0xe24   : > { %v1074_v21 = vadd.f32 %v1912_v13, %v1073_v47 }
 0xe26   : > { %v1078_v32 = vsel %vm1077_vm5, %v1912_v13, %v1074_v21 }
 0xe27   : > { %v1083_v5 = vsel %vm1080_vm6, %v1082_v22, %v1078_v32 }
 0xe28   : > { %v1089_v51 = vmul.f32 %v1087_v30, %v1083_v5  ;;  %v1096_v46 = vsub.f32 1.0, %v1083_v5  ;;  %v1102_v24 = vmul.f32 %v1083_v5, %v2438_v50 }
 0xe2a   : > { %1091 = vrot.lane.b32.xlu1 %v1089_v51, %s2047_s22 }
 0xe9c   : > { %v1092_v53 = vpop.permute.xlu1 %1091 }
 0xe9d   : > { %v1094_v44 = vadd.f32 %v1092_v53, %v1041_v7 }
 0xe9f   : > { %1913 = vtanh.f32 %v1094_v44 }
 0xea5   : > { %v1914_v54 = vpop.eup %1913 }
 0xea6   : > { %1098 = vrot.lane.b32.xlu0 %v1914_v54, %s2045_s16 }
 0xf18   : > { %v1099_v55 = vpop.permute.xlu0 %1098 }
 0xf19   : > { %v1101_v25 = vmul.f32 %v1099_v55, %v1096_v46 }
 0xf1b   : > { %v1103_v26 = vadd.f32 %v1102_v24, %v1101_v25 }
 0xf1d   : > { %1105 = vrot.lane.b32.xlu1 %v1103_v26, %s2045_s16 }
 0xf8f   : > { %v1106_v27 = vpop.permute.xlu1 %1105 }
 0xf90   : > { %v1108_v56 = vsel %vm516_vm1, %v1106_v27, 0.0 }
 0xf91   : > { %1109 = vadd.xlane.f32.xlu0 %v1108_v56 }
0x1004   : > { %v1110_v57 = vpop.xlane.xlu0 %1109 }
0x1005   : > { %v1111_v58 = vmul.f32 %v1110_v57, %v2172_v19 }
0x1007   : > { %v1112_v59 = vsub.f32 %v1103_v26, %v1111_v58 }
0x1009   : > { %v1113_v60 = vmul.f32 %v1112_v59, %v1112_v59 }
0x100b   : > { %1115 = vrot.lane.b32.xlu1 %v1113_v60, %s2045_s16 }
0x107d   : > { %v1116_v17 = vpop.permute.xlu1 %1115 }
0x107e   : > { %v1118_v62 = vsel %vm516_vm1, %v1116_v17, 0.0 }
0x107f   : > { %1119 = vadd.xlane.f32.xlu1 %v1118_v62 }
0x10f2   : > { %v1120_v50 = vpop.xlane.xlu1 %1119 }
0x10f3   : > { %v1121_v0 = vmul.f32 %v1120_v50, %v2172_v19 }
0x10f5   : > { %v1122_v20 = vadd.f32 1e-05, %v1121_v0 }
0x10f7   : > { %1915 = vrsqrt.f32 %v1122_v20  ;;  %vm1129_vm9 = vweird.f32 %v1122_v20 }
0x10fd   : > { %v1916_v2 = vpop.eup %1915 }
0x10fe   : > { %v1124_v4 = vmul.f32 %v1916_v2, %v1122_v20  ;;  %vm1130_vm8 = vweird.f32 %v1916_v2 }
0x10ff   : > { %vm1131_vm10 = vmor %vm1129_vm9, %vm1130_vm8 }
0x1100   : > { %v1125_v15 = vmul.f32 %v1916_v2, %v1124_v4 }
0x1102   : > { %v1126_v28 = vmul.f32 0.5, %v1125_v15 }
0x1104   : > { %v1127_v29 = vsub.f32 1.5, %v1126_v28 }
0x1106   : > { %v1128_v33 = vmul.f32 %v1916_v2, %v1127_v29 }
0x1108   : > { %v1132_v37 = vsel %vm1131_vm10, %v1916_v2, %v1128_v33 }
0x1109   : > { %v1133_v38 = vmul.f32 %v1132_v37, %v1112_v59 }
0x110b   : > { %v1134_v42 = vmul.f32 %v1133_v38, %v2350_v61 }
0x110d   : > { %v1135_v41 = vadd.f32 %v1134_v42, %v2352_v3 }
0x110f   : > { %1137 = vrot.lane.b32.xlu2 %v1135_v41, %s2045_s16 }
0x1169   : > { %v1138_v43 = vpop.permute.xlu2 %1137 }
0x116a   : > { %1781 = vmatmul.msk.f32.vlgmr.msrb.gmra.mxu1 %vm422_vm0, %v1138_v43 }
0x116b   : > { %1478 = vmatpush.msrb.mxu1 %v2255_v34 }
0x116d   : > { %1479 = vmatpush.msrb.mxu1 %v2266_v36 }
0x116f   : > { %1480 = vmatpush.msrb.mxu1 %v2274_v39 }
0x1171   : > { %1481 = vmatpush.msrb.mxu1 %v2277_v40 }
0x11e7   : > { %v1158_v48 = vpop.f32.mrf.mxu1 }
0x11e8   : > { %v1159_v45 = vadd.f32 %v2421_v23, %v1158_v48 }
0x11ea   : > { %v1161_v6 = vmax.f32 %v1159_v45, 0.0 }
0x11ec   : > { %1782 = vmatmul.msk.f32.vlgmr.msrb.gmra.mxu2 %vm827_vm2, %v1161_v6 }
0x126f   : > { %v1182_v7 = vpop.f32.mrf.mxu2 }
0x1270   : > { %1186 = vrot.lane.b32.xlu2 %v1182_v7, %s2046_s19 }
0x12ca   : > { %v1187_v8 = vpop.permute.xlu2 %1186 }
0x12cb   : > { %v1189_v9 = vadd.f32 %v1187_v8, %v1103_v26 }
0x12cd   : > { %v2518_v10 = vadd.f32 %v1189_v9, %v2435_v49 }
0x12cf   : > { %1192 = vrot.lane.b32.xlu0 %v2518_v10, %s2045_s16 }
0x1341   : > { %v1193_v34 = vpop.permute.xlu0 %1192 }
0x1342   : > { %v1195_v36 = vsel %vm516_vm1, %v1193_v34, 0.0 }
0x1343   : > { %1196 = vadd.xlane.f32.xlu2 %v1195_v36 }
0x13b6   : > { %v1197_v39 = vpop.xlane.xlu2 %1196 }
0x13b7   : > { %v1198_v40 = vmul.f32 %v1197_v39, %v2172_v19 }
0x13b9   : > { %v1199_v12 = vsub.f32 %v2518_v10, %v1198_v40 }
0x13bb   : > { %v1200_v13 = vmul.f32 %v1199_v12, %v1199_v12 }
0x13bd   : > { %1202 = vrot.lane.b32.xlu1 %v1200_v13, %s2045_s16 }
0x142f   : > { %v1203_v14 = vpop.permute.xlu1 %1202 }
0x1430   : > { %v1205_v31 = vsel %vm516_vm1, %v1203_v14, 0.0 }
0x1431   : > { %1206 = vadd.xlane.f32.xlu0 %v1205_v31 }
0x14a4   : > { %v1207_v16 = vpop.xlane.xlu0 %1206 }
0x14a5   : > { %v1208_v47 = vmul.f32 %v1207_v16, %v2172_v19 }
0x14a7   : > { %v1209_v18 = vadd.f32 1e-05, %v1208_v47 }
0x14a9   : > { %1917 = vrsqrt.f32 %v1209_v18  ;;  %vm1216_vm13 = vweird.f32 %v1209_v18 }
0x14af   : > { %v1918_v21 = vpop.eup %1917 }
0x14b0   : > { %v1211_v22 = vmul.f32 %v1918_v21, %v1209_v18  ;;  %vm1217_vm11 = vweird.f32 %v1918_v21 }
0x14b1   : > { %vm1218_vm14 = vmor %vm1216_vm13, %vm1217_vm11 }
0x14b2   : > { %v1212_v32 = vmul.f32 %v1918_v21, %v1211_v22 }
0x14b4   : > { %v1213_v30 = vmul.f32 0.5, %v1212_v32 }
0x14b6   : > { %v1214_v5 = vsub.f32 1.5, %v1213_v30 }
0x14b8   : > { %v1215_v51 = vmul.f32 %v1918_v21, %v1214_v5 }
0x14ba   : > { %v1219_v53 = vsel %vm1218_vm14, %v1918_v21, %v1215_v51 }
0x14bb   : > { %v1220_v44 = vmul.f32 %v1219_v53, %v1199_v12 }
0x14bd   : > { %v1221_v54 = vmul.f32 %v1220_v44, %v2457_v63 }
0x14bf   : > { %v1222_v46 = vadd.f32 %v1221_v54, %v2459_v1 }
0x14c1   : > { %1224 = vrot.lane.b32.xlu1 %v1222_v46, %s2045_s16 }
0x1533   : > { %v1225_v55 = vpop.permute.xlu1 %1224 }
0x1534   : > { %1783 = vmatmul.msk.f32.vlgmr.msra.gmra.mxu3 %vm422_vm0, %v1225_v55 }
0x15b7   : > { %v1245_v24 = vpop.f32.mrf.mxu3 }
0x15b8   : > { %v1246_v25 = vadd.f32 %v2260_v35, %v1245_v24 }
0x15ba   : > { %1786 = vmatmul.msk.f32.vlgmr.msrb.gmra.mxu0 %vm422_vm0, %v1246_v25 }
0x15c2   : > { %1789 = vmatmul.msk.f32.vlgmr.msra.gmra.mxu0 %vm422_vm0, %v1193_v34 }
0x1637   : > { %v1268_v26 = vpop.f32.mrf.mxu0 }
0x1638   : > { %v1271_v27 = vsel %vm593_vm12, %v1268_v26, -inf }
0x1639   : > { %v1272_v56 = vrot.slane %v1271_v27, 4 }
0x163b   : > { %v1273_v57 = vmax.f32 %v1271_v27, %v1272_v56 }
0x163d   : > { %v1274_v63 = vrot.slane %v1273_v57, 2 }
0x163f   : > { %v1275_v58 = vmax.f32 %v1273_v57, %v1274_v63  ;;  %v1387_v1 = vpop.f32.mrf.mxu0 }
0x1640   : > { %v1388_v59 = vadd.f32 %v2315_v52, %v1387_v1 }
0x1641   : > { %v1276_v60 = vrot.slane %v1275_v58, 1 }
0x1642   : > { %1411 = vrot.lane.b32.xlu1 %v1388_v59, %s2047_s22 }
0x1643   : > { %v1277_v17 = vmax.f32 %v1275_v58, %v1276_v60 }
0x1645   : > { %v1278_v62 = vsub.f32 %v1268_v26, %v1277_v17 }
0x1647   : > { %v1279_v35 = vmul.f32 1.442695, %v1278_v62 }
0x1649   : > { %1919 = vpow2.f32 %v1279_v35 }
0x164f   : > { %v1920_v50 = vpop.eup %1919 }
0x1650   : > { %v1281_v0 = vsel %vm593_vm12, %v1920_v50, 0.0 }
0x1651   : > { %v1282_v20 = vrot.slane %v1281_v0, 4 }
0x1653   : > { %v1283_v2 = vadd.f32 %v1282_v20, %v1281_v0 }
0x1655   : > { %v1284_v4 = vrot.slane %v1283_v2, 2 }
0x1657   : > { %v1285_v15 = vadd.f32 %v1284_v4, %v1283_v2 }
0x1659   : > { %v1286_v28 = vrot.slane %v1285_v15, 1 }
0x165b   : > { %v1287_v29 = vadd.f32 %v1286_v28, %v1285_v15 }
0x165d   : > { %1921 = vrcp.f32 %v1287_v29  ;;  %v1299_v38 = vand.u32 2147483648, %v1287_v29  ;;  %v1297_v41 = vand.u32 2147483647, %v1287_v29  ;;  %vm1293_vm3 = vweird.f32 %v1287_v29 }
0x165f   : > { %v1300_v48 = vor.u32 1.1754944e-38, %v1299_v38  ;;  %vm1298_vm5 = vcmp.eq.f32.partialorder %v1297_v41, 8.507059e+37 }
0x1663   : > { %v1922_v33 = vpop.eup %1921 }
0x1664   : > { %v1289_v37 = vmul.f32 %v1922_v33, %v1287_v29  ;;  %vm1294_vm15 = vweird.f32 %v1922_v33 }
0x1665   : > { %vm1295_vm4 = vmor %vm1293_vm3, %vm1294_vm15 }
0x1666   : > { %v1290_v52 = vsub.f32 1.0, %v1289_v37 }
0x1668   : > { %v1291_v42 = vmul.f32 %v1922_v33, %v1290_v52 }
0x166a   : > { %v1292_v43 = vadd.f32 %v1922_v33, %v1291_v42 }
0x166c   : > { %v1296_v45 = vsel %vm1295_vm4, %v1922_v33, %v1292_v43 }
0x166d   : > { %v1301_v6 = vsel %vm1298_vm5, %v1300_v48, %v1296_v45 }
0x166e   : > { %v1302_v7 = vmul.f32 %v1920_v50, %v1301_v6 }
0x1670   : > { %v1303_v8 = vadd.f32 1e-08, %v1302_v7 }
0x1672   : > { %v1304_v9 = vsel %vm593_vm12, %v1303_v8, 0.0 }
0x1673   : > { %1305 = vadd.xlane.f32.xlu2 %v1304_v9 }
0x16e6   : > { %v1306_v34 = vpop.xlane.xlu2 %1305 }
0x16e7   : > { %1923 = vrcp.f32 %v1306_v34  ;;  %v1318_v12 = vand.u32 2147483648, %v1306_v34  ;;  %v1316_v14 = vand.u32 2147483647, %v1306_v34  ;;  %vm1312_vm8 = vweird.f32 %v1306_v34 }
0x16e9   : > { %v1319_v16 = vor.u32 1.1754944e-38, %v1318_v12  ;;  %vm1317_vm10 = vcmp.eq.f32.partialorder %v1316_v14, 8.507059e+37  ;;  %v399_v14 = vld [vmem:[#allocation2 + $0x28] sm:$0xff] }
0x16ed   : > { %v1924_v36 = vpop.eup %1923 }
0x16ee   : > { %v1308_v39 = vmul.f32 %v1924_v36, %v1306_v34  ;;  %vm1313_vm6 = vweird.f32 %v1924_v36 }
0x16ef   : > { %vm1314_vm9 = vmor %vm1312_vm8, %vm1313_vm6 }
0x16f0   : > { %v1309_v40 = vsub.f32 1.0, %v1308_v39 }
0x16f2   : > { %v1310_v13 = vmul.f32 %v1924_v36, %v1309_v40 }
0x16f4   : > { %v1311_v31 = vadd.f32 %v1924_v36, %v1310_v13  ;;  %v402_v13 = vld [vmem:[#allocation2 + $0xb8] sm:$0xff] }
0x16f5   : > { %1535 = vmatpush.msra.mxu3 %v402_v13 }
0x16f6   : > { %v1315_v47 = vsel %vm1314_vm9, %v1924_v36, %v1311_v31 }
0x16f7   : > { %v1320_v18 = vsel %vm1317_vm10, %v1319_v16, %v1315_v47 }
0x16f8   : > { %v1321_v21 = vmul.f32 %v1320_v18, %v1303_v8 }
0x16fa   : > { %1787 = vmatmul.msk.f32.vlgmr.msra.gmra.mxu1 %vm651_vm7, %v1321_v21 }
0x1777   : > { %v1342_v22 = vpop.f32.mrf.mxu1 }
0x1778   : > { %1788 = vmatmul.msk.f32.vlgmr.msrb.gmra.mxu3 %vm422_vm0, %v1342_v22  ;;  %v1543_v22 = vld [vmem:[%s334_s23] sm:$0xf] }
0x17fb   : > { %v1365_v32 = vpop.f32.mrf.mxu3 }
0x17fc   : > { %v1366_v30 = vadd.f32 %v2327_v11, %v1365_v32  ;;  %v1412_v11 = vpop.permute.xlu1 %1411  ;;  %v1544_v32 = vmax.f32 %v1543_v22, 1e-20 }
0x17fe   : > { %v1390_v5 = vadd.f32 %v1388_v59, %v1366_v30 }
0x1800   : > { %v1790_v51 = vmul.f32 -1.442695, %v1390_v5 }
0x1802   : > { %1925 = vpow2.f32 %v1790_v51 }
0x1808   : > { %v1926_v53 = vpop.eup %1925 }
0x1809   : > { %v1394_v44 = vadd.f32 1.0, %v1926_v53 }
0x180b   : > { %1927 = vrcp.f32 %v1394_v44  ;;  %v1406_v24 = vand.u32 2147483648, %v1394_v44  ;;  %v1404_v26 = vand.u32 2147483647, %v1394_v44  ;;  %vm1400_vm7 = vweird.f32 %v1394_v44 }
0x180d   : > { %v1407_v56 = vor.u32 1.1754944e-38, %v1406_v24  ;;  %vm1405_vm13 = vcmp.eq.f32.partialorder %v1404_v26, 8.507059e+37 }
0x1811   : > { %v1928_v54 = vpop.eup %1927 }
0x1812   : > { %v1396_v46 = vmul.f32 %v1928_v54, %v1394_v44  ;;  %vm1401_vm12 = vweird.f32 %v1928_v54 }
0x1813   : > { %vm1402_vm11 = vmor %vm1400_vm7, %vm1401_vm12 }
0x1814   : > { %v1397_v55 = vsub.f32 1.0, %v1396_v46 }
0x1816   : > { %v1398_v25 = vmul.f32 %v1928_v54, %v1397_v55 }
0x1818   : > { %v1399_v27 = vadd.f32 %v1928_v54, %v1398_v25 }
0x181a   : > { %v1403_v57 = vsel %vm1402_vm11, %v1928_v54, %v1399_v27 }
0x181b   : > { %v1408_v63 = vsel %vm1405_vm13, %v1407_v56, %v1403_v57 }
0x181c   : > { %v1414_v58 = vmul.f32 %v1412_v11, %v1408_v63  ;;  %v1421_v17 = vsub.f32 1.0, %v1408_v63  ;;  %v1427_v35 = vmul.f32 %v1408_v63, %v2518_v10 }
0x181e   : > { %1416 = vrot.lane.b32.xlu2 %v1414_v58, %s2047_s22  ;;  %s313_s22 = sand.u32 1, %s2031_s25  }
0x181f   : > { %s2564_s17 = sshll.u32 %s313_s22, 2 }
0x1878   : > { %v1417_v1 = vpop.permute.xlu2 %1416 }
0x1879   : > { %v1419_v59 = vadd.f32 %v1417_v1, %v1366_v30 }
0x187b   : > { %1929 = vtanh.f32 %v1419_v59 }
0x1881   : > { %v1930_v60 = vpop.eup %1929 }
0x1882   : > { %1423 = vrot.lane.b32.xlu1 %v1930_v60, %s2045_s16 }
0x18f4   : > { %v1424_v62 = vpop.permute.xlu1 %1423 }
0x18f5   : > { %v1426_v50 = vmul.f32 %v1424_v62, %v1421_v17 }
0x18f7   : > { %v1428_v0 = vadd.f32 %v1427_v35, %v1426_v50 }
0x18f9   : > { %1430 = vrot.lane.b32.xlu0 %v1428_v0, %s2045_s16 }
0x196b   : > { %v1431_v20 = vpop.permute.xlu0 %1430 }
0x196c   : > { %v1433_v2 = vsel %vm516_vm1, %v1431_v20, 0.0 }
0x196d   : > { %1434 = vadd.xlane.f32.xlu1 %v1433_v2 }
0x19e0   : > { %v1435_v4 = vpop.xlane.xlu1 %1434 }
0x19e1   : > { %v1436_v15 = vmul.f32 %v1435_v4, %v2172_v19 }
0x19e3   : > { %v1437_v28 = vsub.f32 %v1428_v0, %v1436_v15 }
0x19e5   : > { %v1438_v29 = vmul.f32 %v1437_v28, %v1437_v28 }
0x19e7   : > { %1440 = vrot.lane.b32.xlu2 %v1438_v29, %s2045_s16 }
0x1a41   : > { %v1441_v33 = vpop.permute.xlu2 %1440 }
0x1a42   : > { %v1443_v37 = vsel %vm516_vm1, %v1441_v33, 0.0 }
0x1a43   : > { %1444 = vadd.xlane.f32.xlu0 %v1443_v37 }
0x1ab6   : > { %v1445_v10 = vpop.xlane.xlu0 %1444 }
0x1ab7   : > { %v1446_v52 = vmul.f32 %v1445_v10, %v2172_v19 }
0x1ab9   : > { %v1447_v38 = vadd.f32 1e-05, %v1446_v52 }
0x1abb   : > { %1931 = vrsqrt.f32 %v1447_v38  ;;  %vm1454_vm15 = vweird.f32 %v1447_v38 }
0x1abc   : > { %1933 = vlog2.f32 %v1544_v32 }
0x1ac1   : > { %v1932_v42 = vpop.eup %1931 }
0x1ac2   : > { %v1449_v41 = vmul.f32 %v1932_v42, %v1447_v38  ;;  %vm1455_vm14 = vweird.f32 %v1932_v42  ;;  %v1934_v30 = vpop.eup %1933 }
0x1ac3   : > { %vm1456_vm3 = vmor %vm1454_vm15, %vm1455_vm14  ;;  %v1546_v5 = vmul.f32 0.6931472, %v1934_v30 }
0x1ac4   : > { %v1450_v43 = vmul.f32 %v1932_v42, %v1449_v41 }
0x1ac5   : > { %v1547_v51 = vsub.f32 0.0, %v1546_v5 }
0x1ac6   : > { %v1451_v48 = vmul.f32 0.5, %v1450_v43 }
0x1ac7   : > { %v1548_v53 = vmax.f32 %v1547_v51, 1e-20 }
0x1ac8   : > { %v1452_v45 = vsub.f32 1.5, %v1451_v48 }
0x1ac9   : > { %1935 = vlog2.f32 %v1548_v53 }
0x1aca   : > { %v1453_v6 = vmul.f32 %v1932_v42, %v1452_v45 }
0x1acc   : > { %v1457_v7 = vsel %vm1456_vm3, %v1932_v42, %v1453_v6 }
0x1acd   : > { %v1458_v8 = vmul.f32 %v1457_v7, %v1437_v28 }
0x1acf   : > { %v1459_v9 = vmul.f32 %v1458_v8, %v2350_v61  ;;  %v401_v61 = vld [vmem:[#allocation2 + $0x88] sm:$0xff]  ;;  %v1936_v55 = vpop.eup %1935 }
0x1ad0   : > { %1536 = vmatpush.msra.mxu3 %v401_v61  ;;  %v1550_v24 = vmul.f32 0.6931472, %v1936_v55 }
0x1ad1   : > { %v1460_v34 = vadd.f32 %v1459_v9, %v2352_v3  ;;  %v400_v3 = vld [vmem:[#allocation2 + $0x58] sm:$0xff] }
0x1ad2   : > { %1537 = vmatpush.msra.mxu3 %v400_v3  ;;  %v1551_v26 = vsub.f32 0.0, %v1550_v24 }
0x1ad3   : > { %1462 = vrot.lane.b32.xlu2 %v1460_v34, %s2045_s16 }
0x1ad4   : > { %1538 = vmatpush.msra.mxu3 %v399_v14 }
0x1b2d   : > { %v1463_v19 = vpop.permute.xlu2 %1462 }
0x1b2e   : > { %1791 = vmatmul.msk.f32.vlgmr.msrb.gmra.mxu1 %vm422_vm0, %v1463_v19 }
0x1bab   : > { %v1483_v36 = vpop.f32.mrf.mxu1 }
0x1bac   : > { %v1484_v39 = vadd.f32 %v2421_v23, %v1483_v36 }
0x1bae   : > { %v1486_v40 = vmax.f32 %v1484_v39, 0.0 }
0x1bb0   : > { %1792 = vmatmul.msk.f32.vlgmr.msra.gmra.mxu2 %vm827_vm2, %v1486_v40 }
0x1c33   : > { %v1507_v12 = vpop.f32.mrf.mxu2 }
0x1c34   : > { %1511 = vrot.lane.b32.xlu2 %v1507_v12, %s2046_s19  ;;  %s315_s19 = scalar_lea.vmem [#allocation5], %s2564_s17 }
0x1c35   : > { %s1624_s15 = sshll.u32 %s315_s19, 4  ;;  %s1625_s15 = int_to_ptr.vmem [resolvable:$true] %s1624_s15 }
0x1c8e   : > { %v1512_v31 = vpop.permute.xlu2 %1511 }
0x1c8f   : > { %v1514_v16 = vadd.f32 %v1512_v31, %v1428_v0 }
0x1c91   : > { %v1515_v23 = vadd.f32 %v1514_v16, %v2435_v49 }
0x1c93   : > { %1517 = vrot.lane.b32.xlu2 %v1515_v23, %s2045_s16  ;;  %s2049_s16 = smov 1  }
0x1ced   : > { %v1518_v47 = vpop.permute.xlu2 %1517 }
0x1cee   : > { %1520 = vst.msk [vmem:[%s315_s19] sm:$0xf] %vm516_vm1, %v1518_v47  ;;  %1793 = vmatmul.msk.f32.vlgmr.msra.gmra.mxu3 %vm422_vm0, %v1518_v47  ;;  %s1993_s19 = scalar_lea.hbm %s2624_s6, 8 }
0x1cef   : > { %p1995_p4 = scmp.lt.s32.totalorder %s1993_s19, %s1989_s28 }
0x1cf1   : > { %p1996_p7 = por %p1995_p4, %p1994_p3 }
0x1cf3   : > { %p1997_p8 = pnand %p1996_p7, %p1992_p2 }
0x1d71   : > { %v1540_v18 = vpop.f32.mrf.mxu3 }
0x1d72   : > { %1561 = vrot.lane.b32.xlu1 %v1540_v18, %s2048_s18  ;;  %v1552_v27 = vadd.f32 %v1551_v26, %v1540_v18 }
0x1de4   : > { %v1562_v49 = vpop.permute.xlu1 %1561 }
0x1de5   : > { %v1564_v21 = vmax.f32 %v1540_v18, %v1562_v49 }
0x1de7   : > { %1569 = vrot.lane.b32.xlu2 %v1564_v21, %s2049_s16  ;;  %v1565_v56 = vsub.f32 %v1540_v18, %v1564_v21 }
0x1de9   : > { %v1566_v57 = vmul.f32 1.442695, %v1565_v56 }
0x1e41   : > { %v1570_v44 = vpop.permute.xlu2 %1569 }
0x1e42   : > { %v1572_v54 = vsub.f32 %v1540_v18, %v1570_v44 }
0x1e44   : > { %v1573_v46 = vmul.f32 1.442695, %v1572_v54 }
0x1e46   : > { %1937 = vpow2.f32 %v1573_v46 }
0x1e47   : > { %1939 = vpow2.f32 %v1566_v57 }
0x1e4c   : > { %v1938_v25 = vpop.eup %1937 }
0x1e4d   : > { %1576 = vrot.lane.b32.xlu2 %v1938_v25, %s2048_s18  ;;  %v1940_v11 = vpop.eup %1939 }
0x1e55   : > { %1554 = vrot.lane.b32.xlu2 %v1552_v27, %s2049_s16 }
0x1ea7   : > { %v1577_v63 = vpop.permute.xlu2 %1576 }
0x1ea8   : > { %v1579_v58 = vadd.f32 %v1940_v11, %v1577_v63 }
0x1eaa   : > { %1581 = vrot.lane.b32.xlu0 %v1579_v58, %s2049_s16  ;;  %s1608_s16 = scalar_lea.sflag [#allocation4], %s313_s22 }
0x1eaf   : > { %v1555_v0 = vpop.permute.xlu2 %1554 }
0x1f1c   : > { %v1582_v1 = vpop.permute.xlu0 %1581 }
0x1f1d   : > { %1941 = vrcp.f32 %v1582_v1  ;;  %v1595_v62 = vand.u32 2147483648, %v1582_v1  ;;  %v1593_v50 = vand.u32 2147483647, %v1582_v1 }
0x1f23   : > { %v1942_v59 = vpop.eup %1941 }
0x1f24   : > { %v1585_v60 = vmul.f32 %v1942_v59, %v1582_v1  ;;  %vm1590_vm0 = vweird.f32 %v1942_v59 }
0x1f26   : > { %v1586_v17 = vsub.f32 1.0, %v1585_v60 }
0x1f28   : > { %v1587_v35 = vmul.f32 %v1942_v59, %v1586_v17 }
0x1f29   : > { %2000 = shalt.err (!%p1997_p8)
}
0x1f2a   : > { %1804 = dma.vmem_to_hbm [thread:$0]  (%p2129_p5), %s1625_s15, 64, %s1627_s20, %s1608_s16   ;;  %v1588_v20 = vadd.f32 %v1942_v59, %v1587_v35  ;;  %vm1589_vm1 = vweird.f32 %v1582_v1  ;;  %v1596_v2 = vor.u32 1.1754944e-38, %v1595_v62  ;;  %vm1557_vm4 = vcmp.gt.f32.partialorder %v1552_v27, %v1555_v0 }
0x1f2b   : > { %vm1591_vm2 = vmor %vm1589_vm1, %vm1590_vm0  ;;  %vm1594_vm5 = vcmp.eq.f32.partialorder %v1593_v50, 8.507059e+37  ;;  %v2050_v29 = vmov 0.0   ;;  %s338_s9 = scalar_lea.vmem %s2625_s7, %s2158_s13  ;;  %vm1605_vm6 = vcmask 3072  }
0x1f2c   : > { %v1592_v4 = vsel %vm1591_vm2, %v1942_v59, %v1588_v20  ;;  %v1794_v33 = vsel %vm1557_vm4, 1.0, %v2050_v29 }
0x1f2d   : > { %v1597_v15 = vsel %vm1594_vm5, %v1596_v2, %v1592_v4 }
0x1f2e   : > { %v1598_v28 = vmul.f32 %v1938_v25, %v1597_v15 }
0x1f30   : > { %v1599_v37 = vadd.f32 %v1794_v33, %v1598_v28 }
0x1f32   : > { %v1600_v10 = vsub.f32 %v1599_v37, %v1598_v28 }
0x1f34   : > { %1602 = vrot.lane.b32.xlu1 %v1600_v10, %s2048_s18 }
0x1fa6   : > { %v1603_v52 = vpop.permute.xlu1 %1602 }
0x1fa7   : > { %1606 = vst.msk [vmem:[%s338_s9] sm:$0xf] %vm1605_vm6, %v1603_v52 }
0x1fa8 PF: > { %p1816_p5 = scmp.ge.s32.totalorder %s2039_s27, 2  ;;  %s1641_s14 = sand.u32 1, %s2027_s24  }
0x1fa9   : > { %s1642_s15 = scalar_lea.sflag [#allocation4], %s1641_s14 }
0x1faa   : > { %p1811_p9 = pnand %p1816_p5, %p2133_p6 }
0x1fac   : > { %p1812_p10 = pneg %p1811_p9 }
0x1fae   : > { %2022 = dma.done.wait (%p1812_p10), %s1642_s15, 64  }
0x1faf   : > { %2024 = vsyncadd (%p1812_p10), %s1642_s15, 4294967232  ;;  %p19_p11 = scmp.ge.s32.totalorder %s2116_s30, 4   ;;  %s2628_s24 = smov %s2031_s25 }
0x1fb0   : > { %s2629_s25 = smov %s2035_s26  ;;  %s2630_s26 = smov %s2127_s10 }
0x1fb1   : > { %s2631_s27 = smov %s2116_s30  ;;  %21 = sbr.rel (!%p19_p11) target bundleno = 4 (0x4), region = 102 }
0x1fb6   :  { %1655 = vsyncpa [#allocation3], 1 }
0x1fb7   :  { %1657 = vsyncpa [#allocation3 + $0x1], 1 }
0x1fb8   :  { %1658 = vsyncpa [#allocation4], 1 }
0x1fb9   :  { %1660 = vsyncpa [#allocation4 + $0x1], 1 }

</bundles_post_ra>
